<compile_context>
chip_gen: v7x
topology: tpu7x:2x2x1
jax: 0.10.0
libtpu: 0.0.40
codegen_flags: <defaults>
</compile_context>

<pallas_src>
import math
import functools

import jax
import jax.numpy as jnp
from jax.experimental import pallas as pl
from jax.experimental.pallas import tpu as pltpu

_GELU_C = math.sqrt(2.0 / math.pi)


# ----------------------------------------------------------------------------
# Helpers
# ----------------------------------------------------------------------------

def _layernorm(h, w, b):
    # h: (R, D) f32;  w, b: (1, D) f32
    mu = jnp.mean(h, axis=-1, keepdims=True)
    var = jnp.mean((h - mu) ** 2, axis=-1, keepdims=True)
    return (h - mu) * jax.lax.rsqrt(var + 1e-5) * w + b


def _pick_tile(dim, target, align):
    """Largest tile <= target that is a multiple of `align` and divides `dim`,
    or the full dim (full-extent blocks are always legal)."""
    if dim <= target:
        return dim
    t = (target // align) * align
    while t >= align:
        if dim % t == 0:
            return t
        t -= align
    return dim


def _pick_group(n_head, head_dim, target=256):
    """Smallest divisor G of n_head with G*head_dim >= target (else n_head)."""
    g = 1
    while g < n_head and g * head_dim < target:
        g += 1
        while n_head % g:
            g += 1
    return g


@functools.lru_cache(maxsize=None)
def _vmem_limit_bytes():
    """~75% of physical VMEM (96 MiB on v5e/v6e, 48 MiB on v7x), capped."""
    cap = 128 * 1024 * 1024
    try:
        info = pltpu.get_tpu_info()
        cap = int(getattr(info, "vmem_capacity_bytes",
                          getattr(info, "vmem_size_bytes", cap)) or cap)
    except Exception:
        pass
    return min(int(cap * 3 // 4), 100 * 1024 * 1024)


# ----------------------------------------------------------------------------
# Pallas kernels
# ----------------------------------------------------------------------------

def attn_block_kernel(x_ref, ln1w, ln1b, wqkv, bqkv, wproj, bproj, o_ref,
                      h1_s, acc, *, group_heads, head_dim, q_chunk):
    """LN1 + multi-head self-attention + c_proj + residual.
    grid=(B, n_groups): one batch element per outer step, G heads per inner
    ("arbitrary") step; the c_proj contribution of each group is accumulated."""
    g_idx = pl.program_id(1)

    @pl.when(g_idx == 0)
    def _init():
        x = x_ref[0]                                              # (L, D) f32
        h1_s[...] = _layernorm(x, ln1w[...], ln1b[...]).astype(jnp.bfloat16)
        acc[...] = jnp.zeros_like(acc)

    G, hd = group_heads, head_dim
    Ghd = G * hd
    h1 = h1_s[...]                                                # (L, D) bf16
    L = h1.shape[0]

    # Fused q|k|v projection for the whole head group: lane-dense output
    # (>=256 lanes at real sizes), one bf16 weight DMA per (batch, group).
    # NOTE: the 1/sqrt(head_dim) scale is pre-folded into the q columns.
    qkv = jnp.dot(h1, wqkv[0], preferred_element_type=jnp.float32) + bqkv[0]

    k_heads = [qkv[:, Ghd + h * hd: Ghd + (h + 1) * hd].astype(jnp.bfloat16)
               for h in range(G)]
    v_heads = [qkv[:, 2 * Ghd + h * hd: 2 * Ghd + (h + 1) * hd].astype(jnp.bfloat16)
               for h in range(G)]

    # q-chunked scores: never materialize the full (L, L) f32 matrix.
    # TODO(synk): for very long sequences, promote the q-chunk to a grid axis
    # (flash-style online softmax) so both v7x TensorCores stay busy at B=1.
    for ci in range(L // q_chunk):
        qs = ci * q_chunk
        ys = []
        for h in range(G):
            q_h = qkv[qs:qs + q_chunk, h * hd:(h + 1) * hd].astype(jnp.bfloat16)
            s = jax.lax.dot_general(q_h, k_heads[h], (((1,), (1,)), ((), ())),
                                    preferred_element_type=jnp.float32)  # (tq, L)
            s = s - jnp.max(s, axis=-1, keepdims=True)
            p = jnp.exp(s)
            p = p * pl.reciprocal(jnp.sum(p, axis=-1, keepdims=True), approx=True)
            ys.append(jnp.dot(p.astype(jnp.bfloat16), v_heads[h],
                              preferred_element_type=jnp.float32))       # (tq, hd)
        y = (jnp.concatenate(ys, axis=-1) if G > 1 else ys[0]).astype(jnp.bfloat16)
        # full-depth (K = G*hd) contraction into the c_proj accumulator
        contrib = jnp.dot(y, wproj[0], preferred_element_type=jnp.float32)  # (tq, D)
        acc[pl.ds(qs, q_chunk), :] = acc[pl.ds(qs, q_chunk), :] + contrib

    @pl.when(g_idx == pl.num_programs(1) - 1)
    def _finalize():
        o_ref[0] = x_ref[0] + acc[...] + bproj[...]               # attn residual


def mlp_block_kernel(x_ref, ln2w, ln2b, wfc_ref, bfc_ref, wcp_ref, bcp, o_ref,
                     h2_s, acc):
    """LN2 + MLP (fc -> GELU -> proj) + residual.
    grid=(row tiles, FFN tiles): FFN (4*D) is a reduction axis so the MLP
    weights are streamed tile-by-tile instead of held resident in VMEM."""
    f_idx = pl.program_id(1)

    @pl.when(f_idx == 0)
    def _init():
        h2_s[...] = _layernorm(x_ref[...], ln2w[...], ln2b[...]).astype(jnp.bfloat16)
        acc[...] = jnp.zeros_like(acc)

    fc = jnp.dot(h2_s[...], wfc_ref[...],
                 preferred_element_type=jnp.float32) + bfc_ref[...]   # (tm, tf)
    # TODO(synk): on v6e/v7x the tanh could take bf16 inputs (2x EUP tput);
    # kept f32 for v5e compatibility.
    g = 0.5 * fc * (1.0 + jnp.tanh(_GELU_C * (fc + 0.044715 * fc ** 3)))
    acc[...] += jnp.dot(g.astype(jnp.bfloat16), wcp_ref[...],
                        preferred_element_type=jnp.float32)           # (tm, D)

    @pl.when(f_idx == pl.num_programs(1) - 1)
    def _finalize():
        o_ref[...] = x_ref[...] + acc[...] + bcp[...]                 # mlp residual


def lm_head_kernel(x_ref, lnfw, lnfb, wlm_ref, o_ref):
    """Final LayerNorm fused with a (row-tile, vocab-tile) slice of lm_head."""
    h = _layernorm(x_ref[...], lnfw[...], lnfb[...]).astype(jnp.bfloat16)
    o_ref[...] = jnp.dot(h, wlm_ref[...], preferred_element_type=jnp.float32)


# ----------------------------------------------------------------------------
# Wrappers
# ----------------------------------------------------------------------------

def attn_forward(x, bp, *, n_head):
    B, L, D = x.shape
    hd = D // n_head
    NG = bp["w_qkv_g"].shape[0]
    G = n_head // NG
    Ghd = G * hd
    tq = _pick_tile(L, 256, 8)

    kernel = functools.partial(attn_block_kernel, group_heads=G, head_dim=hd,
                               q_chunk=tq)

    flops = B * (2 * L * D * 3 * D + 4 * n_head * L * L * hd + 2 * L * D * D)
    transc = B * n_head * L * L
    bytes_accessed = (2 * B * L * D * 4          # x in + out
                      + B * 4 * D * D * 2        # qkv+proj weights per batch elem
                      + B * 8 * D * 4)           # biases / ln params

    # TODO(synk): on v5e, block several batch elements per grid step to avoid
    # re-fetching the per-group attention weights once per batch element.
    return pl.pallas_call(
        kernel,
        out_shape=jax.ShapeDtypeStruct((B, L, D), jnp.float32),
        grid=(B, NG),
        in_specs=[
            pl.BlockSpec((1, L, D), lambda b, g: (b, 0, 0)),          # x
            pl.BlockSpec((1, D), lambda b, g: (0, 0)),                # ln1_w
            pl.BlockSpec((1, D), lambda b, g: (0, 0)),                # ln1_b
            pl.BlockSpec((1, D, 3 * Ghd), lambda b, g: (g, 0, 0)),    # fused Wqkv (group)
            pl.BlockSpec((1, 1, 3 * Ghd), lambda b, g: (g, 0, 0)),    # fused bqkv (group)
            pl.BlockSpec((1, Ghd, D), lambda b, g: (g, 0, 0)),        # Wproj (group rows)
            pl.BlockSpec((1, D), lambda b, g: (0, 0)),                # b_proj
        ],
        out_specs=pl.BlockSpec((1, L, D), lambda b, g: (b, 0, 0)),
        scratch_shapes=[pltpu.VMEM((L, D), jnp.bfloat16),   # LN1 output (reused)
                        pltpu.VMEM((L, D), jnp.float32)],   # c_proj accumulator
        input_output_aliases={0: 0},                        # in-place residual
        compiler_params=pltpu.CompilerParams(
            dimension_semantics=("parallel", "arbitrary"),
            vmem_limit_bytes=_vmem_limit_bytes()),
        cost_estimate=pl.CostEstimate(flops=flops, transcendentals=transc,
                                      bytes_accessed=bytes_accessed),
    )(x, bp["ln1_w"], bp["ln1_b"], bp["w_qkv_g"], bp["b_qkv_g"],
      bp["w_proj_g"], bp["b_proj"])


def mlp_forward(x, bp, *, tm=1024, tf=512):
    B, L, D = x.shape
    F = bp["w_fc"].shape[1]
    M = B * L
    x2 = x.reshape(M, D)
    tm = _pick_tile(M, tm, 8)
    tf = _pick_tile(F, tf, 128)
    grid = (M // tm, F // tf)

    flops = 16 * M * D * D
    transc = 4 * M * D
    bytes_accessed = (2 * M * D * 4 + (M // tm) * 8 * D * D * 2 + 8 * D * 4)

    out = pl.pallas_call(
        mlp_block_kernel,
        out_shape=jax.ShapeDtypeStruct((M, D), jnp.float32),
        grid=grid,
        in_specs=[
            pl.BlockSpec((tm, D), lambda i, f: (i, 0)),               # x1
            pl.BlockSpec((1, D), lambda i, f: (0, 0)),                # ln2_w
            pl.BlockSpec((1, D), lambda i, f: (0, 0)),                # ln2_b
            pl.BlockSpec((D, tf), lambda i, f: (0, f)),               # w_fc tile
            pl.BlockSpec((1, tf), lambda i, f: (0, f)),               # b_fc tile
            pl.BlockSpec((tf, D), lambda i, f: (f, 0)),               # w_cproj tile
            pl.BlockSpec((1, D), lambda i, f: (0, 0)),                # b_cproj
        ],
        out_specs=pl.BlockSpec((tm, D), lambda i, f: (i, 0)),
        scratch_shapes=[pltpu.VMEM((tm, D), jnp.bfloat16),  # LN2 output
                        pltpu.VMEM((tm, D), jnp.float32)],  # MLP accumulator
        input_output_aliases={0: 0},                        # in-place residual
        compiler_params=pltpu.CompilerParams(
            dimension_semantics=("parallel", "arbitrary"),
            vmem_limit_bytes=_vmem_limit_bytes()),
        cost_estimate=pl.CostEstimate(flops=flops, transcendentals=transc,
                                      bytes_accessed=bytes_accessed),
    )(x2, bp["ln2_w"], bp["ln2_b"], bp["w_fc"], bp["b_fc"],
      bp["w_cproj"], bp["b_cproj"])
    return out.reshape(B, L, D)


def lnf_lm_head_forward(x, lnf_w, lnf_b, w_lm_bf16, *, tm=1024, tv=512):
    B, L, D = x.shape
    V = w_lm_bf16.shape[1]
    M = B * L
    x2 = x.reshape(M, D)
    tm = _pick_tile(M, tm, 8)      # large row tile -> fewer w_lm re-streams
    tv = _pick_tile(V, tv, 128)    # lane-dense vocab tile
    grid = (M // tm, V // tv)

    flops = 2 * M * D * V
    bytes_accessed = M * D * 4 + (M // tm) * D * V * 2 + M * V * 4

    out = pl.pallas_call(
        lm_head_kernel,
        out_shape=jax.ShapeDtypeStruct((M, V), jnp.float32),
        grid=grid,
        in_specs=[pl.BlockSpec((tm, D), lambda i, j: (i, 0)),
                  pl.BlockSpec((1, D), lambda i, j: (0, 0)),
                  pl.BlockSpec((1, D), lambda i, j: (0, 0)),
                  pl.BlockSpec((D, tv), lambda i, j: (0, j))],
        out_specs=pl.BlockSpec((tm, tv), lambda i, j: (i, j)),
        compiler_params=pltpu.CompilerParams(
            dimension_semantics=("parallel", "parallel"),
            vmem_limit_bytes=_vmem_limit_bytes()),
        cost_estimate=pl.CostEstimate(flops=flops, transcendentals=0,
                                      bytes_accessed=bytes_accessed),
    )(x2, lnf_w, lnf_b, w_lm_bf16)
    # TODO(synk): emit bf16 logits or fuse cross-entropy to halve the M*V*4
    # writeback once downstream tolerance is verified.
    return out.reshape(B, L, V)


def transformer_forward(idx, params, *, n_head):
    """idx: int32 [B, T] token ids.  `params` must come from prepare_params()."""
    B, T = idx.shape
    tok_emb = jnp.take(params["wte"], idx, axis=0)      # (B, T, D) gather (XLA glue)
    pos_emb = params["wpe"][:T][None, :, :]
    x = tok_emb + pos_emb                               # embd dropout = identity
    for bp in params["blocks"]:
        x = attn_forward(x, bp, n_head=n_head)
        x = mlp_forward(x, bp)
    return lnf_lm_head_forward(x, params["ln_f_w"], params["ln_f_b"],
                               params["w_lm"])
    # TODO(synk): cross-entropy loss branch (y is not None) and generate() loop
    # are host-side glue and not implemented as kernels.


# ----------------------------------------------------------------------------
# Parameter preparation: head-group weight packing, bf16 MXU operands,
# attention scale folded into q weights/bias.
# ----------------------------------------------------------------------------

def prepare_params(params, n_head, group_lane_target=256):
    D = params["wte"].shape[1]
    H = n_head
    hd = D // H
    G = _pick_group(H, hd, target=group_lane_target)
    NG = H // G
    Ghd = G * hd
    inv = 1.0 / math.sqrt(hd)

    def group_cols(w, base):    # (D, 3D) -> (NG, D, Ghd) for q/k/v column block
        blk = w[:, base:base + D]
        return jnp.transpose(blk.reshape(D, NG, Ghd), (1, 0, 2))

    def group_bias(b, base):    # (1, 3D) -> (NG, 1, Ghd)
        blk = b[:, base:base + D]
        return jnp.transpose(blk.reshape(1, NG, Ghd), (1, 0, 2))

    fp = {
        "wte": params["wte"], "wpe": params["wpe"],
        "ln_f_w": params["ln_f_w"], "ln_f_b": params["ln_f_b"],
        "w_lm": params["w_lm"].astype(jnp.bfloat16),
        "blocks": [],
    }
    for lp in params["blocks"]:
        wqkv, bqkv = lp["w_qkv"], lp["b_qkv"]
        wq = group_cols(wqkv, 0) * inv          # fold 1/sqrt(hd) into q
        wk = group_cols(wqkv, D)
        wv = group_cols(wqkv, 2 * D)
        bq = group_bias(bqkv, 0) * inv
        bk = group_bias(bqkv, D)
        bv = group_bias(bqkv, 2 * D)
        fp["blocks"].append({
            "ln1_w": lp["ln1_w"], "ln1_b": lp["ln1_b"],
            "w_qkv_g": jnp.concatenate([wq, wk, wv], axis=-1).astype(jnp.bfloat16),
            "b_qkv_g": jnp.concatenate([bq, bk, bv], axis=-1).astype(jnp.float32),
            # rows g*Ghd .. (g+1)*Ghd-1 of W_proj multiply head-group g outputs
            "w_proj_g": lp["w_proj"].reshape(NG, Ghd, D).astype(jnp.bfloat16),
            "b_proj": lp["b_proj"],
            "ln2_w": lp["ln2_w"], "ln2_b": lp["ln2_b"],
            "w_fc": lp["w_fc"].astype(jnp.bfloat16), "b_fc": lp["b_fc"],
            "w_cproj": lp["w_cproj"].astype(jnp.bfloat16), "b_cproj": lp["b_cproj"],
        })
    return fp


# ----------------------------------------------------------------------------
# Pure-JAX f32 reference (for correctness check)
# ----------------------------------------------------------------------------

def _ref_ln(h, w, b):
    mu = jnp.mean(h, axis=-1, keepdims=True)
    var = jnp.mean((h - mu) ** 2, axis=-1, keepdims=True)
    return (h - mu) / jnp.sqrt(var + 1e-5) * w + b


def reference_forward(idx, params, n_head, n_embd):
    B, T = idx.shape
    hd = n_embd // n_head
    x = jnp.take(params["wte"], idx, axis=0) + params["wpe"][:T][None]
    for lp in params["blocks"]:
        h = _ref_ln(x, lp["ln1_w"], lp["ln1_b"])
        qkv = h @ lp["w_qkv"] + lp["b_qkv"]
        q, k, v = jnp.split(qkv, 3, axis=-1)
        q = q.reshape(B, T, n_head, hd).transpose(0, 2, 1, 3)
        k = k.reshape(B, T, n_head, hd).transpose(0, 2, 1, 3)
        v = v.reshape(B, T, n_head, hd).transpose(0, 2, 1, 3)
        att = jnp.einsum("bhqd,bhkd->bhqk", q, k) / math.sqrt(hd)
        att = jax.nn.softmax(att, axis=-1)
        y = jnp.einsum("bhqk,bhkd->bhqd", att, v)
        y = y.transpose(0, 2, 1, 3).reshape(B, T, n_embd)
        x = x + (y @ lp["w_proj"] + lp["b_proj"])
        h2 = _ref_ln(x, lp["ln2_w"], lp["ln2_b"])
        fc = h2 @ lp["w_fc"] + lp["b_fc"]
        g = 0.5 * fc * (1.0 + jnp.tanh(_GELU_C * (fc + 0.044715 * fc ** 3)))
        x = x + (g @ lp["w_cproj"] + lp["b_cproj"])
    h = _ref_ln(x, params["ln_f_w"], params["ln_f_b"])
    return h @ params["w_lm"]


# ----------------------------------------------------------------------------
# Deterministic parameter init (mirrors Transformer._init_weights), f32, [in,out]
# ----------------------------------------------------------------------------

def init_params(key, n_layer, n_head, n_embd, vocab_size, block_size):
    keys = iter(jax.random.split(key, 8 + 8 * n_layer))
    nrm = lambda k, shape, std=0.02: (std * jax.random.normal(k, shape)
                                      ).astype(jnp.float32)
    cproj_std = 0.02 / math.sqrt(2 * n_layer)

    params = {
        "wte": nrm(next(keys), (vocab_size, n_embd)),
        "wpe": nrm(next(keys), (block_size, n_embd)),
        "ln_f_w": jnp.ones((1, n_embd), jnp.float32),
        "ln_f_b": jnp.zeros((1, n_embd), jnp.float32),
        "w_lm": nrm(next(keys), (n_embd, vocab_size)),   # lm_head, no bias
        "blocks": [],
    }
    for _ in range(n_layer):
        params["blocks"].append({
            "ln1_w": jnp.ones((1, n_embd), jnp.float32),
            "ln1_b": jnp.zeros((1, n_embd), jnp.float32),
            "w_qkv": nrm(next(keys), (n_embd, 3 * n_embd)),
            "b_qkv": jnp.zeros((1, 3 * n_embd), jnp.float32),
            "w_proj": nrm(next(keys), (n_embd, n_embd), std=cproj_std),
            "b_proj": jnp.zeros((1, n_embd), jnp.float32),
            "ln2_w": jnp.ones((1, n_embd), jnp.float32),
            "ln2_b": jnp.zeros((1, n_embd), jnp.float32),
            "w_fc": nrm(next(keys), (n_embd, 4 * n_embd)),
            "b_fc": jnp.zeros((1, 4 * n_embd), jnp.float32),
            "w_cproj": nrm(next(keys), (4 * n_embd, n_embd), std=cproj_std),
            "b_cproj": jnp.zeros((1, n_embd), jnp.float32),
        })
    return params


# ----------------------------------------------------------------------------
# Main
# ----------------------------------------------------------------------------

if __name__ == "__main__":
    n_layer, n_head, n_embd = 2, 4, 32
    vocab_size, block_size = 64, 16
    batch, seq = 2, 8

    key = jax.random.PRNGKey(0)
    k_param, k_idx = jax.random.split(key)
    params = init_params(k_param, n_layer, n_head, n_embd, vocab_size, block_size)
    idx = jax.random.randint(k_idx, (batch, seq), 0, vocab_size, dtype=jnp.int32)

    ref = jax.block_until_ready(reference_forward(idx, params, n_head, n_embd))

    # Run with two head-group settings: default (all heads fused into one
    # group at this tiny size) and a forced multi-group split (exercises the
    # accumulation over the "arbitrary" head-group grid axis).
    for tgt in (256, 16):
        fast_params = prepare_params(params, n_head, group_lane_target=tgt)
        fwd = jax.jit(functools.partial(transformer_forward, n_head=n_head))
        logits = jax.block_until_ready(fwd(idx, fast_params))
        assert logits.shape == (batch, seq, vocab_size)
        # kernel uses bf16 MXU operands + approx reciprocal -> bf16 tolerance
        err = float(jnp.max(jnp.abs(logits - ref)))
        assert err < 2e-2, f"mismatch vs reference (target={tgt}): {err}"

    print("KERNEL_OK")
</pallas_src>

<mosaic_0001>
module attributes {stable_mosaic.version = 11 : i64} {
  func.func @attn_block_kernel(%arg0: i32, %arg1: i32, %arg2: memref<1x8x32xf32, #tpu.memory_space<vmem>>, %arg3: memref<1x32xf32, #tpu.memory_space<vmem>>, %arg4: memref<1x32xf32, #tpu.memory_space<vmem>>, %arg5: memref<1x32x96xbf16, #tpu.memory_space<vmem>>, %arg6: memref<1x1x96xf32, #tpu.memory_space<vmem>>, %arg7: memref<1x32x32xbf16, #tpu.memory_space<vmem>>, %arg8: memref<1x32xf32, #tpu.memory_space<vmem>>, %arg9: memref<1x8x32xf32, #tpu.memory_space<vmem>>, %arg10: memref<8x32xbf16, #tpu.memory_space<vmem>>, %arg11: memref<8x32xf32, #tpu.memory_space<vmem>>) attributes {dimension_semantics = [#tpu.dimension_semantics<parallel>, #tpu.dimension_semantics<arbitrary>], iteration_bounds = array<i64: 2, 1>, scalar_prefetch = 0 : i64, scratch_operands = 2 : i64, tpu.core_type = #tpu.core_type<tc>, window_params = [{transform_indices = @transform_0, window_bounds = array<i64: 1, 8, 32>}, {pipeline_mode = #tpu.pipeline_mode<synchronous>, transform_indices = @transform_1, window_bounds = array<i64: 1, 32>}, {pipeline_mode = #tpu.pipeline_mode<synchronous>, transform_indices = @transform_2, window_bounds = array<i64: 1, 32>}, {transform_indices = @transform_3, window_bounds = array<i64: 1, 32, 96>}, {transform_indices = @transform_4, window_bounds = array<i64: 1, 1, 96>}, {transform_indices = @transform_5, window_bounds = array<i64: 1, 32, 32>}, {pipeline_mode = #tpu.pipeline_mode<synchronous>, transform_indices = @transform_6, window_bounds = array<i64: 1, 32>}, {transform_indices = @transform_7, window_bounds = array<i64: 1, 8, 32>}]} {
    %c0_i32 = arith.constant 0 : i32
    %0 = arith.cmpi eq, %arg1, %c0_i32 : i32
    %1 = arith.extui %0 : i1 to i32
    %c0_i32_0 = arith.constant 0 : i32
    %2 = arith.cmpi ne, %1, %c0_i32_0 : i32
    scf.if %2 {
      %c0_34 = arith.constant 0 : index
      %c0_35 = arith.constant 0 : index
      %c0_36 = arith.constant 0 : index
      %98 = vector.load %arg2[%c0_34, %c0_35, %c0_36] : memref<1x8x32xf32, #tpu.memory_space<vmem>>, vector<1x8x32xf32>
      %99 = vector.shape_cast %98 : vector<1x8x32xf32> to vector<8x32xf32>
      %c0_37 = arith.constant 0 : index
      %c0_38 = arith.constant 0 : index
      %100 = vector.load %arg3[%c0_37, %c0_38] : memref<1x32xf32, #tpu.memory_space<vmem>>, vector<1x32xf32>
      %c0_39 = arith.constant 0 : index
      %c0_40 = arith.constant 0 : index
      %101 = vector.load %arg4[%c0_39, %c0_40] : memref<1x32xf32, #tpu.memory_space<vmem>>, vector<1x32xf32>
      %cst_41 = arith.constant dense<0.000000e+00> : vector<8xf32>
      %102 = vector.multi_reduction <add>, %99, %cst_41 [1] : vector<8x32xf32> to vector<8xf32>
      %103 = vector.shape_cast %102 : vector<8xf32> to vector<8x1xf32>
      %cst_42 = arith.constant 3.200000e+01 : f32
      %104 = vector.broadcast %cst_42 : f32 to vector<8x1xf32>
      %105 = arith.divf %103, %104 : vector<8x1xf32>
      %106 = vector.broadcast %105 : vector<8x1xf32> to vector<8x32xf32>
      %107 = arith.subf %99, %106 : vector<8x32xf32>
      %108 = arith.mulf %107, %107 : vector<8x32xf32>
      %cst_43 = arith.constant dense<0.000000e+00> : vector<8xf32>
      %109 = vector.multi_reduction <add>, %108, %cst_43 [1] : vector<8x32xf32> to vector<8xf32>
      %110 = vector.shape_cast %109 : vector<8xf32> to vector<8x1xf32>
      %cst_44 = arith.constant 3.200000e+01 : f32
      %111 = vector.broadcast %cst_44 : f32 to vector<8x1xf32>
      %112 = arith.divf %110, %111 : vector<8x1xf32>
      %113 = vector.broadcast %105 : vector<8x1xf32> to vector<8x32xf32>
      %114 = arith.subf %99, %113 : vector<8x32xf32>
      %cst_45 = arith.constant 9.99999974E-6 : f32
      %115 = vector.broadcast %cst_45 : f32 to vector<8x1xf32>
      %116 = arith.addf %112, %115 : vector<8x1xf32>
      %117 = math.rsqrt %116 : vector<8x1xf32>
      %118 = vector.broadcast %117 : vector<8x1xf32> to vector<8x32xf32>
      %119 = arith.mulf %114, %118 : vector<8x32xf32>
      %120 = vector.broadcast %100 : vector<1x32xf32> to vector<8x32xf32>
      %121 = arith.mulf %119, %120 : vector<8x32xf32>
      %122 = vector.broadcast %101 : vector<1x32xf32> to vector<8x32xf32>
      %123 = arith.addf %121, %122 : vector<8x32xf32>
      %124 = arith.truncf %123 : vector<8x32xf32> to vector<8x32xbf16>
      %c0_46 = arith.constant 0 : index
      %c0_47 = arith.constant 0 : index
      %125 = vector.load %arg10[%c0_46, %c0_47] : memref<8x32xbf16, #tpu.memory_space<vmem>>, vector<8x32xbf16>
      tpu.vector_store %arg10[%c0_46, %c0_47], %124 {strides = array<i32>} : memref<8x32xbf16, #tpu.memory_space<vmem>>, vector<8x32xbf16>,
      %cst_48 = arith.constant 0.000000e+00 : f32
      %126 = vector.broadcast %cst_48 : f32 to vector<8x32xf32>
      %c0_49 = arith.constant 0 : index
      %c0_50 = arith.constant 0 : index
      %127 = vector.load %arg11[%c0_49, %c0_50] : memref<8x32xf32, #tpu.memory_space<vmem>>, vector<8x32xf32>
      tpu.vector_store %arg11[%c0_49, %c0_50], %126 {strides = array<i32>} : memref<8x32xf32, #tpu.memory_space<vmem>>, vector<8x32xf32>,
    } else {
    }
    %c0 = arith.constant 0 : index
    %c0_1 = arith.constant 0 : index
    %3 = vector.load %arg10[%c0, %c0_1] : memref<8x32xbf16, #tpu.memory_space<vmem>>, vector<8x32xbf16>
    %c0_2 = arith.constant 0 : index
    %c0_3 = arith.constant 0 : index
    %c0_4 = arith.constant 0 : index
    %4 = vector.load %arg5[%c0_2, %c0_3, %c0_4] : memref<1x32x96xbf16, #tpu.memory_space<vmem>>, vector<1x32x96xbf16>
    %5 = vector.shape_cast %4 : vector<1x32x96xbf16> to vector<32x96xbf16>
    %cst = arith.constant dense<0.000000e+00> : vector<8x96xf32>
    %6 = tpu.matmul %3, %5, %cst {dimension_numbers = #tpu.dot_dimension_numbers<[1], [0], [0], [1], [0, 0, 1, 1], [], []>} : vector<8x32xbf16>, vector<32x96xbf16>, vector<8x96xf32> -> vector<8x96xf32>
    %c0_5 = arith.constant 0 : index
    %c0_6 = arith.constant 0 : index
    %c0_7 = arith.constant 0 : index
    %7 = vector.load %arg6[%c0_5, %c0_6, %c0_7] : memref<1x1x96xf32, #tpu.memory_space<vmem>>, vector<1x1x96xf32>
    %8 = vector.shape_cast %7 : vector<1x1x96xf32> to vector<1x96xf32>
    %9 = vector.broadcast %8 : vector<1x96xf32> to vector<8x96xf32>
    %10 = arith.addf %6, %9 : vector<8x96xf32>
    %11 = vector.extract_strided_slice %10 {offsets = [0, 32], sizes = [8, 8], strides = [1, 1]} : vector<8x96xf32> to vector<8x8xf32>
    %12 = arith.truncf %11 : vector<8x8xf32> to vector<8x8xbf16>
    %13 = vector.extract_strided_slice %10 {offsets = [0, 40], sizes = [8, 8], strides = [1, 1]} : vector<8x96xf32> to vector<8x8xf32>
    %14 = arith.truncf %13 : vector<8x8xf32> to vector<8x8xbf16>
    %15 = vector.extract_strided_slice %10 {offsets = [0, 48], sizes = [8, 8], strides = [1, 1]} : vector<8x96xf32> to vector<8x8xf32>
    %16 = arith.truncf %15 : vector<8x8xf32> to vector<8x8xbf16>
    %17 = vector.extract_strided_slice %10 {offsets = [0, 56], sizes = [8, 8], strides = [1, 1]} : vector<8x96xf32> to vector<8x8xf32>
    %18 = arith.truncf %17 : vector<8x8xf32> to vector<8x8xbf16>
    %19 = vector.extract_strided_slice %10 {offsets = [0, 64], sizes = [8, 8], strides = [1, 1]} : vector<8x96xf32> to vector<8x8xf32>
    %20 = arith.truncf %19 : vector<8x8xf32> to vector<8x8xbf16>
    %21 = vector.extract_strided_slice %10 {offsets = [0, 72], sizes = [8, 8], strides = [1, 1]} : vector<8x96xf32> to vector<8x8xf32>
    %22 = arith.truncf %21 : vector<8x8xf32> to vector<8x8xbf16>
    %23 = vector.extract_strided_slice %10 {offsets = [0, 80], sizes = [8, 8], strides = [1, 1]} : vector<8x96xf32> to vector<8x8xf32>
    %24 = arith.truncf %23 : vector<8x8xf32> to vector<8x8xbf16>
    %25 = vector.extract_strided_slice %10 {offsets = [0, 88], sizes = [8, 8], strides = [1, 1]} : vector<8x96xf32> to vector<8x8xf32>
    %26 = arith.truncf %25 : vector<8x8xf32> to vector<8x8xbf16>
    %27 = vector.extract_strided_slice %10 {offsets = [0, 0], sizes = [8, 8], strides = [1, 1]} : vector<8x96xf32> to vector<8x8xf32>
    %28 = arith.truncf %27 : vector<8x8xf32> to vector<8x8xbf16>
    %cst_8 = arith.constant dense<0.000000e+00> : vector<8x8xf32>
    %29 = tpu.matmul %28, %12, %cst_8 {dimension_numbers = #tpu.dot_dimension_numbers<[1], [1], [0], [0], [0, 0, 1, 0], [], []>} : vector<8x8xbf16>, vector<8x8xbf16>, vector<8x8xf32> -> vector<8x8xf32>
    %cst_9 = arith.constant dense<0xFF800000> : vector<8xf32>
    %30 = vector.multi_reduction <maximumf>, %29, %cst_9 [1] : vector<8x8xf32> to vector<8xf32>
    %31 = vector.shape_cast %30 : vector<8xf32> to vector<8x1xf32>
    %32 = vector.broadcast %31 : vector<8x1xf32> to vector<8x8xf32>
    %33 = arith.subf %29, %32 : vector<8x8xf32>
    %34 = math.exp %33 : vector<8x8xf32>
    %cst_10 = arith.constant dense<0.000000e+00> : vector<8xf32>
    %35 = vector.multi_reduction <add>, %34, %cst_10 [1] : vector<8x8xf32> to vector<8xf32>
    %36 = vector.shape_cast %35 : vector<8xf32> to vector<8x1xf32>
    %37 = tpu.reciprocal %36 {approx = true} : vector<8x1xf32> -> vector<8x1xf32>
    %38 = vector.broadcast %37 : vector<8x1xf32> to vector<8x8xf32>
    %39 = arith.mulf %34, %38 : vector<8x8xf32>
    %40 = arith.truncf %39 : vector<8x8xf32> to vector<8x8xbf16>
    %cst_11 = arith.constant dense<0.000000e+00> : vector<8x8xf32>
    %41 = tpu.matmul %40, %20, %cst_11 {dimension_numbers = #tpu.dot_dimension_numbers<[1], [0], [0], [1], [0, 0, 1, 1], [], []>} : vector<8x8xbf16>, vector<8x8xbf16>, vector<8x8xf32> -> vector<8x8xf32>
    %42 = vector.extract_strided_slice %10 {offsets = [0, 8], sizes = [8, 8], strides = [1, 1]} : vector<8x96xf32> to vector<8x8xf32>
    %43 = arith.truncf %42 : vector<8x8xf32> to vector<8x8xbf16>
    %cst_12 = arith.constant dense<0.000000e+00> : vector<8x8xf32>
    %44 = tpu.matmul %43, %14, %cst_12 {dimension_numbers = #tpu.dot_dimension_numbers<[1], [1], [0], [0], [0, 0, 1, 0], [], []>} : vector<8x8xbf16>, vector<8x8xbf16>, vector<8x8xf32> -> vector<8x8xf32>
    %cst_13 = arith.constant dense<0xFF800000> : vector<8xf32>
    %45 = vector.multi_reduction <maximumf>, %44, %cst_13 [1] : vector<8x8xf32> to vector<8xf32>
    %46 = vector.shape_cast %45 : vector<8xf32> to vector<8x1xf32>
    %47 = vector.broadcast %46 : vector<8x1xf32> to vector<8x8xf32>
    %48 = arith.subf %44, %47 : vector<8x8xf32>
    %49 = math.exp %48 : vector<8x8xf32>
    %cst_14 = arith.constant dense<0.000000e+00> : vector<8xf32>
    %50 = vector.multi_reduction <add>, %49, %cst_14 [1] : vector<8x8xf32> to vector<8xf32>
    %51 = vector.shape_cast %50 : vector<8xf32> to vector<8x1xf32>
    %52 = tpu.reciprocal %51 {approx = true} : vector<8x1xf32> -> vector<8x1xf32>
    %53 = vector.broadcast %52 : vector<8x1xf32> to vector<8x8xf32>
    %54 = arith.mulf %49, %53 : vector<8x8xf32>
    %55 = arith.truncf %54 : vector<8x8xf32> to vector<8x8xbf16>
    %cst_15 = arith.constant dense<0.000000e+00> : vector<8x8xf32>
    %56 = tpu.matmul %55, %22, %cst_15 {dimension_numbers = #tpu.dot_dimension_numbers<[1], [0], [0], [1], [0, 0, 1, 1], [], []>} : vector<8x8xbf16>, vector<8x8xbf16>, vector<8x8xf32> -> vector<8x8xf32>
    %57 = vector.extract_strided_slice %10 {offsets = [0, 16], sizes = [8, 8], strides = [1, 1]} : vector<8x96xf32> to vector<8x8xf32>
    %58 = arith.truncf %57 : vector<8x8xf32> to vector<8x8xbf16>
    %cst_16 = arith.constant dense<0.000000e+00> : vector<8x8xf32>
    %59 = tpu.matmul %58, %16, %cst_16 {dimension_numbers = #tpu.dot_dimension_numbers<[1], [1], [0], [0], [0, 0, 1, 0], [], []>} : vector<8x8xbf16>, vector<8x8xbf16>, vector<8x8xf32> -> vector<8x8xf32>
    %cst_17 = arith.constant dense<0xFF800000> : vector<8xf32>
    %60 = vector.multi_reduction <maximumf>, %59, %cst_17 [1] : vector<8x8xf32> to vector<8xf32>
    %61 = vector.shape_cast %60 : vector<8xf32> to vector<8x1xf32>
    %62 = vector.broadcast %61 : vector<8x1xf32> to vector<8x8xf32>
    %63 = arith.subf %59, %62 : vector<8x8xf32>
    %64 = math.exp %63 : vector<8x8xf32>
    %cst_18 = arith.constant dense<0.000000e+00> : vector<8xf32>
    %65 = vector.multi_reduction <add>, %64, %cst_18 [1] : vector<8x8xf32> to vector<8xf32>
    %66 = vector.shape_cast %65 : vector<8xf32> to vector<8x1xf32>
    %67 = tpu.reciprocal %66 {approx = true} : vector<8x1xf32> -> vector<8x1xf32>
    %68 = vector.broadcast %67 : vector<8x1xf32> to vector<8x8xf32>
    %69 = arith.mulf %64, %68 : vector<8x8xf32>
    %70 = arith.truncf %69 : vector<8x8xf32> to vector<8x8xbf16>
    %cst_19 = arith.constant dense<0.000000e+00> : vector<8x8xf32>
    %71 = tpu.matmul %70, %24, %cst_19 {dimension_numbers = #tpu.dot_dimension_numbers<[1], [0], [0], [1], [0, 0, 1, 1], [], []>} : vector<8x8xbf16>, vector<8x8xbf16>, vector<8x8xf32> -> vector<8x8xf32>
    %72 = vector.extract_strided_slice %10 {offsets = [0, 24], sizes = [8, 8], strides = [1, 1]} : vector<8x96xf32> to vector<8x8xf32>
    %73 = arith.truncf %72 : vector<8x8xf32> to vector<8x8xbf16>
    %cst_20 = arith.constant dense<0.000000e+00> : vector<8x8xf32>
    %74 = tpu.matmul %73, %18, %cst_20 {dimension_numbers = #tpu.dot_dimension_numbers<[1], [1], [0], [0], [0, 0, 1, 0], [], []>} : vector<8x8xbf16>, vector<8x8xbf16>, vector<8x8xf32> -> vector<8x8xf32>
    %cst_21 = arith.constant dense<0xFF800000> : vector<8xf32>
    %75 = vector.multi_reduction <maximumf>, %74, %cst_21 [1] : vector<8x8xf32> to vector<8xf32>
    %76 = vector.shape_cast %75 : vector<8xf32> to vector<8x1xf32>
    %77 = vector.broadcast %76 : vector<8x1xf32> to vector<8x8xf32>
    %78 = arith.subf %74, %77 : vector<8x8xf32>
    %79 = math.exp %78 : vector<8x8xf32>
    %cst_22 = arith.constant dense<0.000000e+00> : vector<8xf32>
    %80 = vector.multi_reduction <add>, %79, %cst_22 [1] : vector<8x8xf32> to vector<8xf32>
    %81 = vector.shape_cast %80 : vector<8xf32> to vector<8x1xf32>
    %82 = tpu.reciprocal %81 {approx = true} : vector<8x1xf32> -> vector<8x1xf32>
    %83 = vector.broadcast %82 : vector<8x1xf32> to vector<8x8xf32>
    %84 = arith.mulf %79, %83 : vector<8x8xf32>
    %85 = arith.truncf %84 : vector<8x8xf32> to vector<8x8xbf16>
    %cst_23 = arith.constant dense<0.000000e+00> : vector<8x8xf32>
    %86 = tpu.matmul %85, %26, %cst_23 {dimension_numbers = #tpu.dot_dimension_numbers<[1], [0], [0], [1], [0, 0, 1, 1], [], []>} : vector<8x8xbf16>, vector<8x8xbf16>, vector<8x8xf32> -> vector<8x8xf32>
    %87 = tpu.concatenate %41, %56, %71, %86 in 1 : vector<8x8xf32>, vector<8x8xf32>, vector<8x8xf32>, vector<8x8xf32> -> vector<8x32xf32>
    %88 = arith.truncf %87 : vector<8x32xf32> to vector<8x32xbf16>
    %c0_24 = arith.constant 0 : index
    %c0_25 = arith.constant 0 : index
    %c0_26 = arith.constant 0 : index
    %89 = vector.load %arg7[%c0_24, %c0_25, %c0_26] : memref<1x32x32xbf16, #tpu.memory_space<vmem>>, vector<1x32x32xbf16>
    %90 = vector.shape_cast %89 : vector<1x32x32xbf16> to vector<32x32xbf16>
    %cst_27 = arith.constant dense<0.000000e+00> : vector<8x32xf32>
    %91 = tpu.matmul %88, %90, %cst_27 {dimension_numbers = #tpu.dot_dimension_numbers<[1], [0], [0], [1], [0, 0, 1, 1], [], []>} : vector<8x32xbf16>, vector<32x32xbf16>, vector<8x32xf32> -> vector<8x32xf32>
    %c0_28 = arith.constant 0 : index
    %c0_29 = arith.constant 0 : index
    %92 = vector.load %arg11[%c0_28, %c0_29] : memref<8x32xf32, #tpu.memory_space<vmem>>, vector<8x32xf32>
    %93 = arith.addf %92, %91 : vector<8x32xf32>
    %c0_30 = arith.constant 0 : index
    %c0_31 = arith.constant 0 : index
    %94 = vector.load %arg11[%c0_30, %c0_31] : memref<8x32xf32, #tpu.memory_space<vmem>>, vector<8x32xf32>
    tpu.vector_store %arg11[%c0_30, %c0_31], %93 {strides = array<i32>} : memref<8x32xf32, #tpu.memory_space<vmem>>, vector<8x32xf32>,
    %c0_i32_32 = arith.constant 0 : i32
    %95 = arith.cmpi eq, %arg1, %c0_i32_32 : i32
    %96 = arith.extui %95 : i1 to i32
    %c0_i32_33 = arith.constant 0 : i32
    %97 = arith.cmpi ne, %96, %c0_i32_33 : i32
    scf.if %97 {
      %c0_34 = arith.constant 0 : index
      %c0_35 = arith.constant 0 : index
      %c0_36 = arith.constant 0 : index
      %98 = vector.load %arg2[%c0_34, %c0_35, %c0_36] : memref<1x8x32xf32, #tpu.memory_space<vmem>>, vector<1x8x32xf32>
      %99 = vector.shape_cast %98 : vector<1x8x32xf32> to vector<8x32xf32>
      %c0_37 = arith.constant 0 : index
      %c0_38 = arith.constant 0 : index
      %100 = vector.load %arg11[%c0_37, %c0_38] : memref<8x32xf32, #tpu.memory_space<vmem>>, vector<8x32xf32>
      %101 = arith.addf %99, %100 : vector<8x32xf32>
      %c0_39 = arith.constant 0 : index
      %c0_40 = arith.constant 0 : index
      %102 = vector.load %arg8[%c0_39, %c0_40] : memref<1x32xf32, #tpu.memory_space<vmem>>, vector<1x32xf32>
      %103 = vector.broadcast %102 : vector<1x32xf32> to vector<8x32xf32>
      %104 = arith.addf %101, %103 : vector<8x32xf32>
      %c0_41 = arith.constant 0 : index
      %c0_42 = arith.constant 0 : index
      %c0_43 = arith.constant 0 : index
      %105 = vector.load %arg9[%c0_41, %c0_42, %c0_43] : memref<1x8x32xf32, #tpu.memory_space<vmem>>, vector<1x8x32xf32>
      %106 = vector.shape_cast %105 : vector<1x8x32xf32> to vector<8x32xf32>
      %107 = vector.shape_cast %104 : vector<8x32xf32> to vector<1x8x32xf32>
      tpu.vector_store %arg9[%c0_41, %c0_42, %c0_43], %107 {strides = array<i32>} : memref<1x8x32xf32, #tpu.memory_space<vmem>>, vector<1x8x32xf32>,
    } else {
    }
    return
  }
  func.func @transform_0(%arg0: i32, %arg1: i32) -> (i32, i32, i32) {
    %c0_i32 = arith.constant 0 : i32
    %c0_i32_0 = arith.constant 0 : i32
    %c0_i32_1 = arith.constant 0 : i32
    return %arg0, %c0_i32, %c0_i32_0 : i32, i32, i32
  }
  func.func @transform_1(%arg0: i32, %arg1: i32) -> (i32, i32) {
    %c0_i32 = arith.constant 0 : i32
    %c0_i32_0 = arith.constant 0 : i32
    %c0_i32_1 = arith.constant 0 : i32
    return %c0_i32, %c0_i32_0 : i32, i32
  }
  func.func @transform_2(%arg0: i32, %arg1: i32) -> (i32, i32) {
    %c0_i32 = arith.constant 0 : i32
    %c0_i32_0 = arith.constant 0 : i32
    %c0_i32_1 = arith.constant 0 : i32
    return %c0_i32, %c0_i32_0 : i32, i32
  }
  func.func @transform_3(%arg0: i32, %arg1: i32) -> (i32, i32, i32) {
    %c0_i32 = arith.constant 0 : i32
    %c0_i32_0 = arith.constant 0 : i32
    %c0_i32_1 = arith.constant 0 : i32
    return %arg1, %c0_i32, %c0_i32_0 : i32, i32, i32
  }
  func.func @transform_4(%arg0: i32, %arg1: i32) -> (i32, i32, i32) {
    %c0_i32 = arith.constant 0 : i32
    %c0_i32_0 = arith.constant 0 : i32
    %c0_i32_1 = arith.constant 0 : i32
    return %arg1, %c0_i32, %c0_i32_0 : i32, i32, i32
  }
  func.func @transform_5(%arg0: i32, %arg1: i32) -> (i32, i32, i32) {
    %c0_i32 = arith.constant 0 : i32
    %c0_i32_0 = arith.constant 0 : i32
    %c0_i32_1 = arith.constant 0 : i32
    return %arg1, %c0_i32, %c0_i32_0 : i32, i32, i32
  }
  func.func @transform_6(%arg0: i32, %arg1: i32) -> (i32, i32) {
    %c0_i32 = arith.constant 0 : i32
    %c0_i32_0 = arith.constant 0 : i32
    %c0_i32_1 = arith.constant 0 : i32
    return %c0_i32, %c0_i32_0 : i32, i32
  }
  func.func @transform_7(%arg0: i32, %arg1: i32) -> (i32, i32, i32) {
    %c0_i32 = arith.constant 0 : i32
    %c0_i32_0 = arith.constant 0 : i32
    %c0_i32_1 = arith.constant 0 : i32
    return %arg0, %c0_i32, %c0_i32_0 : i32, i32, i32
  }
}

module attributes {stable_mosaic.version = 11 : i64} {
  func.func @lm_head_kernel(%arg0: i32, %arg1: i32, %arg2: memref<16x32xf32, #tpu.memory_space<vmem>>, %arg3: memref<1x32xf32, #tpu.memory_space<vmem>>, %arg4: memref<1x32xf32, #tpu.memory_space<vmem>>, %arg5: memref<32x64xbf16, #tpu.memory_space<vmem>>, %arg6: memref<16x64xf32, #tpu.memory_space<vmem>>) attributes {dimension_semantics = [#tpu.dimension_semantics<parallel>, #tpu.dimension_semantics<parallel>], iteration_bounds = array<i64: 1, 1>, scalar_prefetch = 0 : i64, scratch_operands = 0 : i64, tpu.core_type = #tpu.core_type<tc>, window_params = [{transform_indices = @transform_0, window_bounds = array<i64: 16, 32>}, {pipeline_mode = #tpu.pipeline_mode<synchronous>, transform_indices = @transform_1, window_bounds = array<i64: 1, 32>}, {pipeline_mode = #tpu.pipeline_mode<synchronous>, transform_indices = @transform_2, window_bounds = array<i64: 1, 32>}, {transform_indices = @transform_3, window_bounds = array<i64: 32, 64>}, {transform_indices = @transform_4, window_bounds = array<i64: 16, 64>}]} {
    %c0 = arith.constant 0 : index
    %c0_0 = arith.constant 0 : index
    %0 = vector.load %arg2[%c0, %c0_0] : memref<16x32xf32, #tpu.memory_space<vmem>>, vector<16x32xf32>
    %c0_1 = arith.constant 0 : index
    %c0_2 = arith.constant 0 : index
    %1 = vector.load %arg3[%c0_1, %c0_2] : memref<1x32xf32, #tpu.memory_space<vmem>>, vector<1x32xf32>
    %c0_3 = arith.constant 0 : index
    %c0_4 = arith.constant 0 : index
    %2 = vector.load %arg4[%c0_3, %c0_4] : memref<1x32xf32, #tpu.memory_space<vmem>>, vector<1x32xf32>
    %cst = arith.constant dense<0.000000e+00> : vector<16xf32>
    %3 = vector.multi_reduction <add>, %0, %cst [1] : vector<16x32xf32> to vector<16xf32>
    %4 = vector.shape_cast %3 : vector<16xf32> to vector<16x1xf32>
    %cst_5 = arith.constant 3.200000e+01 : f32
    %5 = vector.broadcast %cst_5 : f32 to vector<16x1xf32>
    %6 = arith.divf %4, %5 : vector<16x1xf32>
    %7 = vector.broadcast %6 : vector<16x1xf32> to vector<16x32xf32>
    %8 = arith.subf %0, %7 : vector<16x32xf32>
    %9 = arith.mulf %8, %8 : vector<16x32xf32>
    %cst_6 = arith.constant dense<0.000000e+00> : vector<16xf32>
    %10 = vector.multi_reduction <add>, %9, %cst_6 [1] : vector<16x32xf32> to vector<16xf32>
    %11 = vector.shape_cast %10 : vector<16xf32> to vector<16x1xf32>
    %cst_7 = arith.constant 3.200000e+01 : f32
    %12 = vector.broadcast %cst_7 : f32 to vector<16x1xf32>
    %13 = arith.divf %11, %12 : vector<16x1xf32>
    %14 = vector.broadcast %6 : vector<16x1xf32> to vector<16x32xf32>
    %15 = arith.subf %0, %14 : vector<16x32xf32>
    %cst_8 = arith.constant 9.99999974E-6 : f32
    %16 = vector.broadcast %cst_8 : f32 to vector<16x1xf32>
    %17 = arith.addf %13, %16 : vector<16x1xf32>
    %18 = math.rsqrt %17 : vector<16x1xf32>
    %19 = vector.broadcast %18 : vector<16x1xf32> to vector<16x32xf32>
    %20 = arith.mulf %15, %19 : vector<16x32xf32>
    %21 = vector.broadcast %1 : vector<1x32xf32> to vector<16x32xf32>
    %22 = arith.mulf %20, %21 : vector<16x32xf32>
    %23 = vector.broadcast %2 : vector<1x32xf32> to vector<16x32xf32>
    %24 = arith.addf %22, %23 : vector<16x32xf32>
    %25 = arith.truncf %24 : vector<16x32xf32> to vector<16x32xbf16>
    %c0_9 = arith.constant 0 : index
    %c0_10 = arith.constant 0 : index
    %26 = vector.load %arg5[%c0_9, %c0_10] : memref<32x64xbf16, #tpu.memory_space<vmem>>, vector<32x64xbf16>
    %cst_11 = arith.constant dense<0.000000e+00> : vector<16x64xf32>
    %27 = tpu.matmul %25, %26, %cst_11 {dimension_numbers = #tpu.dot_dimension_numbers<[1], [0], [0], [1], [0, 0, 1, 1], [], []>} : vector<16x32xbf16>, vector<32x64xbf16>, vector<16x64xf32> -> vector<16x64xf32>
    %c0_12 = arith.constant 0 : index
    %c0_13 = arith.constant 0 : index
    %28 = vector.load %arg6[%c0_12, %c0_13] : memref<16x64xf32, #tpu.memory_space<vmem>>, vector<16x64xf32>
    tpu.vector_store %arg6[%c0_12, %c0_13], %27 {strides = array<i32>} : memref<16x64xf32, #tpu.memory_space<vmem>>, vector<16x64xf32>,
    return
  }
  func.func @transform_0(%arg0: i32, %arg1: i32) -> (i32, i32) {
    %c0_i32 = arith.constant 0 : i32
    %c0_i32_0 = arith.constant 0 : i32
    return %arg0, %c0_i32 : i32, i32
  }
  func.func @transform_1(%arg0: i32, %arg1: i32) -> (i32, i32) {
    %c0_i32 = arith.constant 0 : i32
    %c0_i32_0 = arith.constant 0 : i32
    %c0_i32_1 = arith.constant 0 : i32
    return %c0_i32, %c0_i32_0 : i32, i32
  }
  func.func @transform_2(%arg0: i32, %arg1: i32) -> (i32, i32) {
    %c0_i32 = arith.constant 0 : i32
    %c0_i32_0 = arith.constant 0 : i32
    %c0_i32_1 = arith.constant 0 : i32
    return %c0_i32, %c0_i32_0 : i32, i32
  }
  func.func @transform_3(%arg0: i32, %arg1: i32) -> (i32, i32) {
    %c0_i32 = arith.constant 0 : i32
    %c0_i32_0 = arith.constant 0 : i32
    return %c0_i32, %arg1 : i32, i32
  }
  func.func @transform_4(%arg0: i32, %arg1: i32) -> (i32, i32) {
    %c0_i32 = arith.constant 0 : i32
    return %arg0, %arg1 : i32, i32
  }
}

module attributes {stable_mosaic.version = 11 : i64} {
  func.func @mlp_block_kernel(%arg0: i32, %arg1: i32, %arg2: memref<16x32xf32, #tpu.memory_space<vmem>>, %arg3: memref<1x32xf32, #tpu.memory_space<vmem>>, %arg4: memref<1x32xf32, #tpu.memory_space<vmem>>, %arg5: memref<32x128xbf16, #tpu.memory_space<vmem>>, %arg6: memref<1x128xf32, #tpu.memory_space<vmem>>, %arg7: memref<128x32xbf16, #tpu.memory_space<vmem>>, %arg8: memref<1x32xf32, #tpu.memory_space<vmem>>, %arg9: memref<16x32xf32, #tpu.memory_space<vmem>>, %arg10: memref<16x32xbf16, #tpu.memory_space<vmem>>, %arg11: memref<16x32xf32, #tpu.memory_space<vmem>>) attributes {dimension_semantics = [#tpu.dimension_semantics<parallel>, #tpu.dimension_semantics<arbitrary>], iteration_bounds = array<i64: 1, 1>, scalar_prefetch = 0 : i64, scratch_operands = 2 : i64, tpu.core_type = #tpu.core_type<tc>, window_params = [{transform_indices = @transform_0, window_bounds = array<i64: 16, 32>}, {pipeline_mode = #tpu.pipeline_mode<synchronous>, transform_indices = @transform_1, window_bounds = array<i64: 1, 32>}, {pipeline_mode = #tpu.pipeline_mode<synchronous>, transform_indices = @transform_2, window_bounds = array<i64: 1, 32>}, {transform_indices = @transform_3, window_bounds = array<i64: 32, 128>}, {transform_indices = @transform_4, window_bounds = array<i64: 1, 128>}, {transform_indices = @transform_5, window_bounds = array<i64: 128, 32>}, {pipeline_mode = #tpu.pipeline_mode<synchronous>, transform_indices = @transform_6, window_bounds = array<i64: 1, 32>}, {transform_indices = @transform_7, window_bounds = array<i64: 16, 32>}]} {
    %c0_i32 = arith.constant 0 : i32
    %0 = arith.cmpi eq, %arg1, %c0_i32 : i32
    %1 = arith.extui %0 : i1 to i32
    %c0_i32_0 = arith.constant 0 : i32
    %2 = arith.cmpi ne, %1, %c0_i32_0 : i32
    scf.if %2 {
      %c0_19 = arith.constant 0 : index
      %c0_20 = arith.constant 0 : index
      %31 = vector.load %arg2[%c0_19, %c0_20] : memref<16x32xf32, #tpu.memory_space<vmem>>, vector<16x32xf32>
      %c0_21 = arith.constant 0 : index
      %c0_22 = arith.constant 0 : index
      %32 = vector.load %arg3[%c0_21, %c0_22] : memref<1x32xf32, #tpu.memory_space<vmem>>, vector<1x32xf32>
      %c0_23 = arith.constant 0 : index
      %c0_24 = arith.constant 0 : index
      %33 = vector.load %arg4[%c0_23, %c0_24] : memref<1x32xf32, #tpu.memory_space<vmem>>, vector<1x32xf32>
      %cst_25 = arith.constant dense<0.000000e+00> : vector<16xf32>
      %34 = vector.multi_reduction <add>, %31, %cst_25 [1] : vector<16x32xf32> to vector<16xf32>
      %35 = vector.shape_cast %34 : vector<16xf32> to vector<16x1xf32>
      %cst_26 = arith.constant 3.200000e+01 : f32
      %36 = vector.broadcast %cst_26 : f32 to vector<16x1xf32>
      %37 = arith.divf %35, %36 : vector<16x1xf32>
      %38 = vector.broadcast %37 : vector<16x1xf32> to vector<16x32xf32>
      %39 = arith.subf %31, %38 : vector<16x32xf32>
      %40 = arith.mulf %39, %39 : vector<16x32xf32>
      %cst_27 = arith.constant dense<0.000000e+00> : vector<16xf32>
      %41 = vector.multi_reduction <add>, %40, %cst_27 [1] : vector<16x32xf32> to vector<16xf32>
      %42 = vector.shape_cast %41 : vector<16xf32> to vector<16x1xf32>
      %cst_28 = arith.constant 3.200000e+01 : f32
      %43 = vector.broadcast %cst_28 : f32 to vector<16x1xf32>
      %44 = arith.divf %42, %43 : vector<16x1xf32>
      %45 = vector.broadcast %37 : vector<16x1xf32> to vector<16x32xf32>
      %46 = arith.subf %31, %45 : vector<16x32xf32>
      %cst_29 = arith.constant 9.99999974E-6 : f32
      %47 = vector.broadcast %cst_29 : f32 to vector<16x1xf32>
      %48 = arith.addf %44, %47 : vector<16x1xf32>
      %49 = math.rsqrt %48 : vector<16x1xf32>
      %50 = vector.broadcast %49 : vector<16x1xf32> to vector<16x32xf32>
      %51 = arith.mulf %46, %50 : vector<16x32xf32>
      %52 = vector.broadcast %32 : vector<1x32xf32> to vector<16x32xf32>
      %53 = arith.mulf %51, %52 : vector<16x32xf32>
      %54 = vector.broadcast %33 : vector<1x32xf32> to vector<16x32xf32>
      %55 = arith.addf %53, %54 : vector<16x32xf32>
      %56 = arith.truncf %55 : vector<16x32xf32> to vector<16x32xbf16>
      %c0_30 = arith.constant 0 : index
      %c0_31 = arith.constant 0 : index
      %57 = vector.load %arg10[%c0_30, %c0_31] : memref<16x32xbf16, #tpu.memory_space<vmem>>, vector<16x32xbf16>
      tpu.vector_store %arg10[%c0_30, %c0_31], %56 {strides = array<i32>} : memref<16x32xbf16, #tpu.memory_space<vmem>>, vector<16x32xbf16>,
      %cst_32 = arith.constant 0.000000e+00 : f32
      %58 = vector.broadcast %cst_32 : f32 to vector<16x32xf32>
      %c0_33 = arith.constant 0 : index
      %c0_34 = arith.constant 0 : index
      %59 = vector.load %arg11[%c0_33, %c0_34] : memref<16x32xf32, #tpu.memory_space<vmem>>, vector<16x32xf32>
      tpu.vector_store %arg11[%c0_33, %c0_34], %58 {strides = array<i32>} : memref<16x32xf32, #tpu.memory_space<vmem>>, vector<16x32xf32>,
    } else {
    }
    %c0 = arith.constant 0 : index
    %c0_1 = arith.constant 0 : index
    %3 = vector.load %arg10[%c0, %c0_1] : memref<16x32xbf16, #tpu.memory_space<vmem>>, vector<16x32xbf16>
    %c0_2 = arith.constant 0 : index
    %c0_3 = arith.constant 0 : index
    %4 = vector.load %arg5[%c0_2, %c0_3] : memref<32x128xbf16, #tpu.memory_space<vmem>>, vector<32x128xbf16>
    %cst = arith.constant dense<0.000000e+00> : vector<16x128xf32>
    %5 = tpu.matmul %3, %4, %cst {dimension_numbers = #tpu.dot_dimension_numbers<[1], [0], [0], [1], [0, 0, 1, 1], [], []>} : vector<16x32xbf16>, vector<32x128xbf16>, vector<16x128xf32> -> vector<16x128xf32>
    %c0_4 = arith.constant 0 : index
    %c0_5 = arith.constant 0 : index
    %6 = vector.load %arg6[%c0_4, %c0_5] : memref<1x128xf32, #tpu.memory_space<vmem>>, vector<1x128xf32>
    %7 = vector.broadcast %6 : vector<1x128xf32> to vector<16x128xf32>
    %8 = arith.addf %5, %7 : vector<16x128xf32>
    %cst_6 = arith.constant 5.000000e-01 : f32
    %9 = vector.broadcast %cst_6 : f32 to vector<16x128xf32>
    %10 = arith.mulf %9, %8 : vector<16x128xf32>
    %11 = arith.mulf %8, %8 : vector<16x128xf32>
    %12 = arith.mulf %8, %11 : vector<16x128xf32>
    %cst_7 = arith.constant 4.471500e-02 : f32
    %13 = vector.broadcast %cst_7 : f32 to vector<16x128xf32>
    %14 = arith.mulf %13, %12 : vector<16x128xf32>
    %15 = arith.addf %8, %14 : vector<16x128xf32>
    %cst_8 = arith.constant 0.797884583 : f32
    %16 = vector.broadcast %cst_8 : f32 to vector<16x128xf32>
    %17 = arith.mulf %16, %15 : vector<16x128xf32>
    %18 = math.tanh %17 : vector<16x128xf32>
    %cst_9 = arith.constant 1.000000e+00 : f32
    %19 = vector.broadcast %cst_9 : f32 to vector<16x128xf32>
    %20 = arith.addf %19, %18 : vector<16x128xf32>
    %21 = arith.mulf %10, %20 : vector<16x128xf32>
    %c0_10 = arith.constant 0 : index
    %c0_11 = arith.constant 0 : index
    %22 = vector.load %arg11[%c0_10, %c0_11] : memref<16x32xf32, #tpu.memory_space<vmem>>, vector<16x32xf32>
    %23 = arith.truncf %21 : vector<16x128xf32> to vector<16x128xbf16>
    %c0_12 = arith.constant 0 : index
    %c0_13 = arith.constant 0 : index
    %24 = vector.load %arg7[%c0_12, %c0_13] : memref<128x32xbf16, #tpu.memory_space<vmem>>, vector<128x32xbf16>
    %cst_14 = arith.constant dense<0.000000e+00> : vector<16x32xf32>
    %25 = tpu.matmul %23, %24, %cst_14 {dimension_numbers = #tpu.dot_dimension_numbers<[1], [0], [0], [1], [0, 0, 1, 1], [], []>} : vector<16x128xbf16>, vector<128x32xbf16>, vector<16x32xf32> -> vector<16x32xf32>
    %26 = arith.addf %22, %25 : vector<16x32xf32>
    %c0_15 = arith.constant 0 : index
    %c0_16 = arith.constant 0 : index
    %27 = vector.load %arg11[%c0_15, %c0_16] : memref<16x32xf32, #tpu.memory_space<vmem>>, vector<16x32xf32>
    tpu.vector_store %arg11[%c0_15, %c0_16], %26 {strides = array<i32>} : memref<16x32xf32, #tpu.memory_space<vmem>>, vector<16x32xf32>,
    %c0_i32_17 = arith.constant 0 : i32
    %28 = arith.cmpi eq, %arg1, %c0_i32_17 : i32
    %29 = arith.extui %28 : i1 to i32
    %c0_i32_18 = arith.constant 0 : i32
    %30 = arith.cmpi ne, %29, %c0_i32_18 : i32
    scf.if %30 {
      %c0_19 = arith.constant 0 : index
      %c0_20 = arith.constant 0 : index
      %31 = vector.load %arg2[%c0_19, %c0_20] : memref<16x32xf32, #tpu.memory_space<vmem>>, vector<16x32xf32>
      %c0_21 = arith.constant 0 : index
      %c0_22 = arith.constant 0 : index
      %32 = vector.load %arg11[%c0_21, %c0_22] : memref<16x32xf32, #tpu.memory_space<vmem>>, vector<16x32xf32>
      %33 = arith.addf %31, %32 : vector<16x32xf32>
      %c0_23 = arith.constant 0 : index
      %c0_24 = arith.constant 0 : index
      %34 = vector.load %arg8[%c0_23, %c0_24] : memref<1x32xf32, #tpu.memory_space<vmem>>, vector<1x32xf32>
      %35 = vector.broadcast %34 : vector<1x32xf32> to vector<16x32xf32>
      %36 = arith.addf %33, %35 : vector<16x32xf32>
      %c0_25 = arith.constant 0 : index
      %c0_26 = arith.constant 0 : index
      %37 = vector.load %arg9[%c0_25, %c0_26] : memref<16x32xf32, #tpu.memory_space<vmem>>, vector<16x32xf32>
      tpu.vector_store %arg9[%c0_25, %c0_26], %36 {strides = array<i32>} : memref<16x32xf32, #tpu.memory_space<vmem>>, vector<16x32xf32>,
    } else {
    }
    return
  }
  func.func @transform_0(%arg0: i32, %arg1: i32) -> (i32, i32) {
    %c0_i32 = arith.constant 0 : i32
    %c0_i32_0 = arith.constant 0 : i32
    return %arg0, %c0_i32 : i32, i32
  }
  func.func @transform_1(%arg0: i32, %arg1: i32) -> (i32, i32) {
    %c0_i32 = arith.constant 0 : i32
    %c0_i32_0 = arith.constant 0 : i32
    %c0_i32_1 = arith.constant 0 : i32
    return %c0_i32, %c0_i32_0 : i32, i32
  }
  func.func @transform_2(%arg0: i32, %arg1: i32) -> (i32, i32) {
    %c0_i32 = arith.constant 0 : i32
    %c0_i32_0 = arith.constant 0 : i32
    %c0_i32_1 = arith.constant 0 : i32
    return %c0_i32, %c0_i32_0 : i32, i32
  }
  func.func @transform_3(%arg0: i32, %arg1: i32) -> (i32, i32) {
    %c0_i32 = arith.constant 0 : i32
    %c0_i32_0 = arith.constant 0 : i32
    return %c0_i32, %arg1 : i32, i32
  }
  func.func @transform_4(%arg0: i32, %arg1: i32) -> (i32, i32) {
    %c0_i32 = arith.constant 0 : i32
    %c0_i32_0 = arith.constant 0 : i32
    return %c0_i32, %arg1 : i32, i32
  }
  func.func @transform_5(%arg0: i32, %arg1: i32) -> (i32, i32) {
    %c0_i32 = arith.constant 0 : i32
    %c0_i32_0 = arith.constant 0 : i32
    return %arg1, %c0_i32 : i32, i32
  }
  func.func @transform_6(%arg0: i32, %arg1: i32) -> (i32, i32) {
    %c0_i32 = arith.constant 0 : i32
    %c0_i32_0 = arith.constant 0 : i32
    %c0_i32_1 = arith.constant 0 : i32
    return %c0_i32, %c0_i32_0 : i32, i32
  }
  func.func @transform_7(%arg0: i32, %arg1: i32) -> (i32, i32) {
    %c0_i32 = arith.constant 0 : i32
    %c0_i32_0 = arith.constant 0 : i32
    return %arg0, %c0_i32 : i32, i32
  }
}

</mosaic_0001>

<bundles_post_ra>
// kernel: transformer_forward.9
= control target key start
LH: loop header
LB: loop body
LE: loop exit
PB: predicated region body
PF: predicated region fallthrough
CT: control target
= control target key end

     0   :  { %9 = vsyncpa [#allocation3], 0  ;;  %s473_s0 = inlined_call_operand.hbm [shape: f32[16,32], index: 0, kind: input, shape index: {}]   ;;  %s474_s1 = inlined_call_operand.hbm [shape: f32[1,32], index: 1, kind: input, shape index: {}]   ;;  %s475_s2 = inlined_call_operand.hbm [shape: f32[1,32], index: 2, kind: input, shape index: {}]   ;;  %s476_s3 = inlined_call_operand.hbm [shape: bf16[32,64], index: 3, kind: input, shape index: {}]   ;;  %s477_s4 = inlined_call_operand.hbm [shape: f32[16,64], index: 4, kind: output, shape index: {}]  }
   0x1   :  { %10 = vsyncpa [#allocation6], 0 }
   0x2   :  { %11 = vsyncpa [#allocation9], 0 }
   0x3   :  { %12 = vsyncpa [#allocation4], 0  ;;  %s352_s15 = smov [#allocation5]   ;;  %s353_s17 = smov [#allocation2]  }
   0x4   :  { %s31_s16 = sshll.u32 %s352_s15, 4  ;;  %s18_s18 = sshll.u32 %s353_s17, 4  ;;  %s32_s16 = int_to_ptr.vmem [resolvable:$true] %s31_s16  ;;  %s388_s18 = int_to_ptr.vmem [resolvable:$true] %s18_s18 }
   0x5   :  { %s234_s21 = scalar_lea.hbm %s474_s1, 16 }
   0x6   :  { %p235_p0 = scmp.ne.s32.totalorder %s474_s1, %s234_s21  ;;  %p238_p1 = scmp.lt.u32.totalorder %s234_s21, %s474_s1 }
   0x8   :  { %p240_p2 = pnand %p238_p1, %p235_p0 }
   0xa   :  { %243 = shalt.err (!%p240_p2)
}
   0xb   :  { %s244_s26 = scalar_lea.vmem %s32_s16, 16  ;;  %s248_s27 = scalar_lea.vmem %s32_s16, 32 }
   0xc   :  { %p245_p3 = scmp.ne.s32.totalorder %s32_s16, %s244_s26  ;;  %p249_p4 = scmp.lt.s32.totalorder %s32_s16, %s32_s16 }
   0xd   :  { %p250_p5 = scmp.lt.s32.totalorder %s248_s27, %s244_s26 }
   0xf   :  { %p251_p6 = por %p250_p5, %p249_p4 }
  0x11   :  { %p252_p7 = pnand %p251_p6, %p245_p3 }
  0x13   :  { %255 = shalt.err (!%p252_p7)
}
  0x14   :  { %34 = dma.hbm_to_vmem [thread:$0]  %s474_s1, 16, %s32_s16, [#allocation6]  }
  0x15   :  { %s256_s6 = scalar_lea.hbm %s473_s0, 256 }
  0x16   :  { %p257_p8 = scmp.ne.s32.totalorder %s473_s0, %s256_s6  ;;  %p260_p9 = scmp.lt.u32.totalorder %s256_s6, %s473_s0 }
  0x18   :  { %p262_p10 = pnand %p260_p9, %p257_p8 }
  0x1a   :  { %265 = shalt.err (!%p262_p10)
}
  0x1b   :  { %s266_s11 = scalar_lea.vmem %s388_s18, 256  ;;  %p271_p12 = scmp.lt.s32.totalorder %s388_s18, %s388_s18 }
  0x1c   :  { %p267_p11 = scmp.ne.s32.totalorder %s388_s18, %s266_s11  ;;  %p272_p13 = scmp.lt.s32.totalorder %s266_s11, %s266_s11 }
  0x1e   :  { %p273_p0 = por %p272_p13, %p271_p12 }
  0x20   :  { %p274_p1 = pnand %p273_p0, %p267_p11 }
  0x22   :  { %277 = shalt.err (!%p274_p1)
}
  0x23   :  { %s354_s1 = smov 128   ;;  %s355_s12 = smov 8  }
  0x24   :  { %24 = dma.hbm_to_vmem [thread:$0]  %s473_s0, 256, %s388_s18, [#allocation3], %s354_s1, %s354_s1, %s355_s12  }
  0x25   :  { %s356_s15 = smov [#allocation7]   ;;  %s357_s17 = smov [#allocation8]  }
  0x26   :  { %s41_s16 = sshll.u32 %s356_s15, 4  ;;  %s50_s19 = sshll.u32 %s357_s17, 4  ;;  %s42_s16 = int_to_ptr.vmem [resolvable:$true] %s41_s16  ;;  %s422_s19 = int_to_ptr.vmem [resolvable:$true] %s50_s19 }
  0x27   :  { %s278_s22 = scalar_lea.hbm %s475_s2, 16 }
  0x28   :  { %p279_p2 = scmp.ne.s32.totalorder %s475_s2, %s278_s22  ;;  %p282_p3 = scmp.lt.u32.totalorder %s278_s22, %s475_s2 }
  0x2a   :  { %p284_p4 = pnand %p282_p3, %p279_p2 }
  0x2c   :  { %287 = shalt.err (!%p284_p4)
}
  0x2d   :  { %s288_s0 = scalar_lea.vmem %s42_s16, 16  ;;  %s292_s18 = scalar_lea.vmem %s42_s16, 32 }
  0x2e   :  { %p289_p5 = scmp.ne.s32.totalorder %s42_s16, %s288_s0  ;;  %p293_p6 = scmp.lt.s32.totalorder %s42_s16, %s42_s16 }
  0x2f   :  { %p294_p7 = scmp.lt.s32.totalorder %s292_s18, %s288_s0 }
  0x31   :  { %p295_p8 = por %p294_p7, %p293_p6 }
  0x33   :  { %p296_p9 = pnand %p295_p8, %p289_p5 }
  0x35   :  { %299 = shalt.err (!%p296_p9)
}
  0x36   :  { %44 = dma.hbm_to_vmem [thread:$0]  %s475_s2, 16, %s42_s16, [#allocation6]  }
  0x37   :  { %s300_s5 = scalar_lea.hbm %s476_s3, 256 }
  0x38   :  { %p301_p10 = scmp.ne.s32.totalorder %s476_s3, %s300_s5  ;;  %p304_p11 = scmp.lt.u32.totalorder %s300_s5, %s476_s3 }
  0x3a   :  { %p306_p12 = pnand %p304_p11, %p301_p10 }
  0x3c   :  { %309 = shalt.err (!%p306_p12)
}
  0x3d   :  { %s310_s10 = scalar_lea.vmem %s422_s19, 256  ;;  %p315_p0 = scmp.lt.s32.totalorder %s422_s19, %s422_s19 }
  0x3e   :  { %p311_p13 = scmp.ne.s32.totalorder %s422_s19, %s310_s10  ;;  %p316_p1 = scmp.lt.s32.totalorder %s310_s10, %s310_s10 }
  0x40   :  { %p317_p2 = por %p316_p1, %p315_p0 }
  0x42   :  { %p318_p3 = pnand %p317_p2, %p311_p13 }
  0x44   :  { %321 = shalt.err (!%p318_p3)
}
  0x45   :  { %s358_s2 = smov 64   ;;  %s359_s11 = smov 4  }
  0x46   :  { %56 = dma.hbm_to_vmem [thread:$0]  %s476_s3, 256, %s422_s19, [#allocation9], %s358_s2, %s358_s2, %s359_s11  }
  0x47   :  { %344 = dma.done.wait [#allocation3], 256  }
  0x48   :  { %345 = vsyncadd [#allocation3], 4294967040 }
  0x49   :  { %346 = dma.done.wait [#allocation6], 32  }
  0x4a   :  { %347 = vsyncadd [#allocation6], 4294967264 }
  0x4b   :  { %348 = dma.done.wait [#allocation9], 256  }
  0x4c   :  { %349 = vsyncadd [#allocation9], 4294967040  ;;  %vm74_vm0 = vcmask 261120   ;;  %v70_v0 = vld [vmem:[#allocation2] sm:$0xff]  ;;  %v71_v1 = vld [vmem:[#allocation2 + $0x8] sm:$0xff]  ;;  %v360_v15 = vmov 0.0  }
  0x4d   :  { %v75_v2 = vsel %vm74_vm0, %v70_v0, 0.0  ;;  %v78_v3 = vsel %vm74_vm0, %v71_v1, 0.0  ;;  %v228_v14 = vld [vmem:[#allocation8] sm:$0xff]   ;;  %209 = vmatprep.subr.bf16.mxu0 %v360_v15  ;;  %v229_v16 = vld [vmem:[#allocation8 + $0x8] sm:$0xff]   ;;  %vm361_vm1 = vmmov 0   ;;  %vm179_vm2 = vcmask 523264  }
  0x4e   :  { %76 = vadd.xlane.f32.xlu0 %v75_v2  ;;  %210 = vmatpush3.bf16.msra.mxu0 %v228_v14  ;;  %v201_v25 = vld [vmem:[#allocation5] ss:$0 sm:$0xff]  ;;  %v202_v29 = vld [vmem:[#allocation7] ss:$0 sm:$0xff]  ;;  %s362_s3 = smov [#allocation10]  }
  0x4f   :  { %213 = vmatprep.mubr.msk.bf16.mxu0 %vm361_vm1, %v360_v15  ;;  %211 = vmatprep.subr.bf16.mxu0 %v360_v15  ;;  %s187_s15 = sshll.u32 %s362_s3, 4  ;;  %s188_s15 = int_to_ptr.vmem [resolvable:$true] %s187_s15 }
  0x50   :  { %s322_s16 = scalar_lea.vmem %s188_s15, 256  ;;  %p327_p5 = scmp.lt.s32.totalorder %s188_s15, %s188_s15 }
  0x51   :  { %p323_p4 = scmp.ne.s32.totalorder %s188_s15, %s322_s16  ;;  %p328_p6 = scmp.lt.s32.totalorder %s322_s16, %s322_s16 }
  0x52   :  { %79 = vadd.xlane.f32.xlu0 %v78_v3  ;;  %212 = vmatpush3.bf16.msra.mxu0 %v229_v16 }
  0x53   :  { %p329_p7 = por %p328_p6, %p327_p5 }
  0x55   :  { %p330_p8 = pnand %p329_p7, %p323_p4 }
  0xdb   :  { %v77_v4 = vpop.xlane.xlu0 %76 }
  0xdc   :  { %v82_v5 = vmul.f32 0.03125, %v77_v4 }
  0xde   :  { %v84_v6 = vsub.f32 %v70_v0, %v82_v5 }
  0xdf   :  { %v80_v7 = vpop.xlane.xlu0 %79 }
  0xe0   :  { %v83_v8 = vmul.f32 0.03125, %v80_v7  ;;  %v86_v9 = vmul.f32 %v84_v6, %v84_v6 }
  0xe2   :  { %v85_v10 = vsub.f32 %v71_v1, %v83_v8  ;;  %v88_v11 = vsel %vm74_vm0, %v86_v9, 0.0 }
  0xe3   :  { %89 = vadd.xlane.f32.xlu1 %v88_v11 }
  0xe4   :  { %v87_v12 = vmul.f32 %v85_v10, %v85_v10 }
  0xe6   :  { %v91_v13 = vsel %vm74_vm0, %v87_v12, 0.0 }
  0xe7   :  { %92 = vadd.xlane.f32.xlu1 %v91_v13 }
 0x170   :  { %v90_v17 = vpop.xlane.xlu1 %89 }
 0x171   :  { %v94_v18 = vmul.f32 0.03125, %v90_v17 }
 0x173   :  { %v96_v19 = vadd.f32 1e-05, %v94_v18 }
 0x174   :  { %v93_v20 = vpop.xlane.xlu1 %92 }
 0x175   :  { %230 = vrsqrt.f32 %v96_v19  ;;  %v95_v21 = vmul.f32 0.03125, %v93_v20 }
 0x177   :  { %v97_v22 = vadd.f32 1e-05, %v95_v21 }
 0x179   :  { %232 = vrsqrt.f32 %v97_v22 }
 0x17f   :  { %v231_v23 = vpop.eup %230 }
 0x180   :  { %v100_v24 = vmul.f32 %v231_v23, %v84_v6 }
 0x182   :  { %v108_v28 = vmul.f32 %v201_v25, %v100_v24 }
 0x183   :  { %v233_v26 = vpop.eup %232 }
 0x184   :  { %v101_v27 = vmul.f32 %v233_v26, %v85_v10  ;;  %v116_v31 = vadd.f32 %v202_v29, %v108_v28 }
 0x186   :  { %v109_v30 = vmul.f32 %v201_v25, %v101_v27 }
 0x188   :  { %v117_v32 = vadd.f32 %v202_v29, %v109_v30 }
 0x18a   :  { %v118_v33 = vpack.c.bf16 %v117_v32, %v116_v31 }
 0x18c   :  { %214 = vmatmul.mubr.msk.bf16.vlgmr.msra.gmra.mrb[0].mxu0 %vm74_vm0, %v118_v33 }
 0x25f   :  { %v172_v34 = vpop.f32.mrb[0].mxu0 }
 0x260   :  { %180 = vst.msk [vmem:[#allocation10] sm:$0xff] %vm179_vm2, %v172_v34  ;;  %v215_v35 = vpop.f32.mrb[1].mxu0 }
 0x261   :  { %v175_v36 = vpop.f32.mrb[2].mxu0 }
 0x262   :  { %181 = vst.msk [vmem:[#allocation10 + $0x8] sm:$0xff] %vm179_vm2, %v175_v36  ;;  %v216_v37 = vpop.f32.mrb[3].mxu0 }
 0x263   :  { %333 = shalt.err (!%p330_p8)
}
 0x264   :  { %s334_s20 = scalar_lea.hbm %s477_s4, 256 }
 0x265   :  { %p335_p9 = scmp.ne.s32.totalorder %s477_s4, %s334_s20  ;;  %p338_p10 = scmp.lt.u32.totalorder %s334_s20, %s477_s4 }
 0x267   :  { %p340_p11 = pnand %p338_p10, %p335_p9 }
 0x269   :  { %343 = shalt.err (!%p340_p11)
}
 0x26a   :  { %193 = dma.vmem_to_hbm [thread:$0]  %s188_s15, 256, %s477_s4, [#allocation4], %s354_s1, %s354_s1, %s355_s12  }
 0x26b   :  { %350 = dma.done.wait [#allocation4], 256  }
 0x26c   :  { %351 = vsyncadd [#allocation4], 4294967040 }
 0x26d   :  { %197 = vsyncpa [#allocation3], 1 }
 0x26e   :  { %198 = vsyncpa [#allocation6], 1 }
 0x26f   :  { %199 = vsyncpa [#allocation9], 1 }
 0x270   :  { %200 = vsyncpa [#allocation4], 1 }

// kernel: transformer_forward.6
= control target key start
LH: loop header
LB: loop body
LE: loop exit
PB: predicated region body
PF: predicated region fallthrough
CT: control target
= control target key end

     0   :  { %12 = vsyncpa [#allocation5], 0  ;;  %s875_s0 = inlined_call_operand.hbm [shape: f32[16,32], index: 0, kind: input, shape index: {}, may-alias: {0,7}]   ;;  %s876_s1 = inlined_call_operand.hbm [shape: f32[1,32], index: 1, kind: input, shape index: {}]   ;;  %s877_s2 = inlined_call_operand.hbm [shape: f32[1,32], index: 2, kind: input, shape index: {}]   ;;  %s878_s3 = inlined_call_operand.hbm [shape: bf16[32,128], index: 3, kind: input, shape index: {}]   ;;  %s879_s4 = inlined_call_operand.hbm [shape: f32[1,128], index: 4, kind: input, shape index: {}]   ;;  %s880_s5 = inlined_call_operand.hbm [shape: bf16[128,32], index: 5, kind: input, shape index: {}]   ;;  %s881_s6 = inlined_call_operand.hbm [shape: f32[1,32], index: 6, kind: input, shape index: {}]   ;;  %s882_s7 = inlined_call_operand.hbm [shape: f32[16,32], index: 7, kind: output, shape index: {}, may-alias: {0,7}]  }
   0x1   :  { %13 = vsyncpa [#allocation8], 0 }
   0x2   :  { %14 = vsyncpa [#allocation11], 0 }
   0x3   :  { %15 = vsyncpa [#allocation14], 0 }
   0x4   :  { %16 = vsyncpa [#allocation6], 0  ;;  %s683_s24 = smov [#allocation7]   ;;  %s684_s26 = smov [#allocation10]  }
   0x5   :  { %s35_s25 = sshll.u32 %s683_s24, 4  ;;  %s54_s27 = sshll.u32 %s684_s26, 4  ;;  %s36_s25 = int_to_ptr.vmem [resolvable:$true] %s35_s25  ;;  %s737_s27 = int_to_ptr.vmem [resolvable:$true] %s54_s27 }
   0x6   :  { %s497_s30 = scalar_lea.hbm %s876_s1, 16 }
   0x7   :  { %p498_p0 = scmp.ne.s32.totalorder %s876_s1, %s497_s30  ;;  %p501_p1 = scmp.lt.u32.totalorder %s497_s30, %s876_s1 }
   0x9   :  { %p503_p2 = pnand %p501_p1, %p498_p0 }
   0xb   :  { %506 = shalt.err (!%p503_p2)
}
   0xc   :  { %s507_s12 = scalar_lea.vmem %s36_s25, 16  ;;  %s511_s13 = scalar_lea.vmem %s36_s25, 32 }
   0xd   :  { %p508_p3 = scmp.ne.s32.totalorder %s36_s25, %s507_s12  ;;  %p512_p4 = scmp.lt.s32.totalorder %s36_s25, %s36_s25 }
   0xe   :  { %p513_p5 = scmp.lt.s32.totalorder %s511_s13, %s507_s12 }
  0x10   :  { %p514_p6 = por %p513_p5, %p512_p4 }
  0x12   :  { %p515_p7 = pnand %p514_p6, %p508_p3 }
  0x14   :  { %518 = shalt.err (!%p515_p7)
}
  0x15   :  { %38 = dma.hbm_to_vmem [thread:$0]  %s876_s1, 16, %s36_s25, [#allocation8]  }
  0x16   :  { %s519_s18 = scalar_lea.hbm %s878_s3, 256 }
  0x17   :  { %p520_p8 = scmp.ne.s32.totalorder %s878_s3, %s519_s18  ;;  %p523_p9 = scmp.lt.u32.totalorder %s519_s18, %s878_s3 }
  0x19   :  { %p525_p10 = pnand %p523_p9, %p520_p8 }
  0x1b   :  { %528 = shalt.err (!%p525_p10)
}
  0x1c   :  { %s529_s23 = scalar_lea.vmem %s737_s27, 256  ;;  %p534_p12 = scmp.lt.s32.totalorder %s737_s27, %s737_s27 }
  0x1d   :  { %p530_p11 = scmp.ne.s32.totalorder %s737_s27, %s529_s23  ;;  %p535_p13 = scmp.lt.s32.totalorder %s529_s23, %s529_s23 }
  0x1f   :  { %p536_p0 = por %p535_p13, %p534_p12 }
  0x21   :  { %p537_p1 = pnand %p536_p0, %p530_p11 }
  0x23   :  { %540 = shalt.err (!%p537_p1)
}
  0x24   :  { %s685_s1 = smov 64   ;;  %s686_s24 = smov 4  }
  0x25   :  { %60 = dma.hbm_to_vmem [thread:$0]  %s878_s3, 256, %s737_s27, [#allocation11], %s685_s1, %s685_s1, %s686_s24  }
  0x26   :  { %s687_s28 = smov [#allocation13]   ;;  %s688_s30 = smov [#allocation4]  }
  0x27   :  { %s76_s29 = sshll.u32 %s687_s28, 4  ;;  %s22_s8 = sshll.u32 %s688_s30, 4  ;;  %s77_s29 = int_to_ptr.vmem [resolvable:$true] %s76_s29  ;;  %s768_s8 = int_to_ptr.vmem [resolvable:$true] %s22_s8 }
  0x28   :  { %s541_s11 = scalar_lea.hbm %s880_s5, 1024 }
  0x29   :  { %p542_p2 = scmp.ne.s32.totalorder %s880_s5, %s541_s11  ;;  %p545_p3 = scmp.lt.u32.totalorder %s541_s11, %s880_s5 }
  0x2b   :  { %p547_p4 = pnand %p545_p3, %p542_p2 }
  0x2d   :  { %550 = shalt.err (!%p547_p4)
}
  0x2e   :  { %s551_s3 = scalar_lea.vmem %s77_s29, 1024  ;;  %p556_p6 = scmp.lt.s32.totalorder %s77_s29, %s77_s29 }
  0x2f   :  { %p552_p5 = scmp.ne.s32.totalorder %s77_s29, %s551_s3  ;;  %p557_p7 = scmp.lt.s32.totalorder %s551_s3, %s551_s3 }
  0x31   :  { %p558_p8 = por %p557_p7, %p556_p6 }
  0x33   :  { %p559_p9 = pnand %p558_p8, %p552_p5 }
  0x35   :  { %562 = shalt.err (!%p559_p9)
}
  0x36   :  { %82 = dma.hbm_to_vmem [thread:$0]  %s880_s5, 1024, %s77_s29, [#allocation14], %s685_s1, %s685_s1, %s686_s24  }
  0x37   :  { %s563_s19 = scalar_lea.hbm %s875_s0, 256 }
  0x38   :  { %p564_p10 = scmp.ne.s32.totalorder %s875_s0, %s563_s19  ;;  %p567_p11 = scmp.lt.u32.totalorder %s563_s19, %s875_s0 }
  0x3a   :  { %p569_p12 = pnand %p567_p11, %p564_p10 }
  0x3c   :  { %572 = shalt.err (!%p569_p12)
}
  0x3d   :  { %s573_s25 = scalar_lea.vmem %s768_s8, 256  ;;  %p578_p0 = scmp.lt.s32.totalorder %s768_s8, %s768_s8 }
  0x3e   :  { %p574_p13 = scmp.ne.s32.totalorder %s768_s8, %s573_s25  ;;  %p579_p1 = scmp.lt.s32.totalorder %s573_s25, %s573_s25 }
  0x40   :  { %p580_p2 = por %p579_p1, %p578_p0 }
  0x42   :  { %p581_p3 = pnand %p580_p2, %p574_p13 }
  0x44   :  { %584 = shalt.err (!%p581_p3)
}
  0x45   :  { %s689_s5 = smov 128   ;;  %s690_s1 = smov 8  }
  0x46   :  { %28 = dma.hbm_to_vmem [thread:$0]  %s875_s0, 256, %s768_s8, [#allocation5], %s689_s5, %s689_s5, %s690_s1  }
  0x47   :  { %s691_s28 = smov [#allocation9]   ;;  %s692_s30 = smov [#allocation12]  }
  0x48   :  { %s45_s29 = sshll.u32 %s691_s28, 4  ;;  %s67_s9 = sshll.u32 %s692_s30, 4  ;;  %s46_s29 = int_to_ptr.vmem [resolvable:$true] %s45_s29  ;;  %s68_s9 = int_to_ptr.vmem [resolvable:$true] %s67_s9 }
  0x49   :  { %s585_s12 = scalar_lea.hbm %s877_s2, 16 }
  0x4a   :  { %p586_p4 = scmp.ne.s32.totalorder %s877_s2, %s585_s12  ;;  %p589_p5 = scmp.lt.u32.totalorder %s585_s12, %s877_s2 }
  0x4c   :  { %p591_p6 = pnand %p589_p5, %p586_p4 }
  0x4e   :  { %594 = shalt.err (!%p591_p6)
}
  0x4f   :  { %s595_s0 = scalar_lea.vmem %s46_s29, 16  ;;  %s599_s8 = scalar_lea.vmem %s46_s29, 32 }
  0x50   :  { %p596_p7 = scmp.ne.s32.totalorder %s46_s29, %s595_s0  ;;  %p600_p8 = scmp.lt.s32.totalorder %s46_s29, %s46_s29 }
  0x51   :  { %p601_p9 = scmp.lt.s32.totalorder %s599_s8, %s595_s0 }
  0x53   :  { %p602_p10 = por %p601_p9, %p600_p8 }
  0x55   :  { %p603_p11 = pnand %p602_p10, %p596_p7 }
  0x57   :  { %606 = shalt.err (!%p603_p11)
}
  0x58   :  { %48 = dma.hbm_to_vmem [thread:$0]  %s877_s2, 16, %s46_s29, [#allocation8]  }
  0x59   :  { %s607_s19 = scalar_lea.hbm %s879_s4, 16 }
  0x5a   :  { %p608_p12 = scmp.ne.s32.totalorder %s879_s4, %s607_s19  ;;  %p611_p13 = scmp.lt.u32.totalorder %s607_s19, %s879_s4 }
  0x5c   :  { %p613_p0 = pnand %p611_p13, %p608_p12 }
  0x5e   :  { %616 = shalt.err (!%p613_p0)
}
  0x5f   :  { %s617_s25 = scalar_lea.vmem %s68_s9, 16  ;;  %s621_s24 = scalar_lea.vmem %s68_s9, 32 }
  0x60   :  { %p618_p1 = scmp.ne.s32.totalorder %s68_s9, %s617_s25  ;;  %p622_p2 = scmp.lt.s32.totalorder %s68_s9, %s68_s9 }
  0x61   :  { %p623_p3 = scmp.lt.s32.totalorder %s621_s24, %s617_s25 }
  0x63   :  { %p624_p4 = por %p623_p3, %p622_p2 }
  0x65   :  { %p625_p5 = pnand %p624_p4, %p618_p1 }
  0x67   :  { %628 = shalt.err (!%p625_p5)
}
  0x68   :  { %70 = dma.hbm_to_vmem [thread:$0]  %s879_s4, 16, %s68_s9, [#allocation11]  }
  0x69   :  { %s693_s28 = smov [#allocation15]   ;;  %s629_s11 = scalar_lea.hbm %s881_s6, 16 }
  0x6a   :  { %s89_s29 = sshll.u32 %s693_s28, 4  ;;  %p630_p6 = scmp.ne.s32.totalorder %s881_s6, %s629_s11  ;;  %s90_s29 = int_to_ptr.vmem [resolvable:$true] %s89_s29 }
  0x6b   :  { %p633_p7 = scmp.lt.u32.totalorder %s629_s11, %s881_s6 }
  0x6d   :  { %p635_p8 = pnand %p633_p7, %p630_p6 }
  0x6f   :  { %638 = shalt.err (!%p635_p8)
}
  0x70   :  { %s639_s3 = scalar_lea.vmem %s90_s29, 16  ;;  %s643_s4 = scalar_lea.vmem %s90_s29, 32 }
  0x71   :  { %p640_p9 = scmp.ne.s32.totalorder %s90_s29, %s639_s3  ;;  %p644_p10 = scmp.lt.s32.totalorder %s90_s29, %s90_s29 }
  0x72   :  { %p645_p11 = scmp.lt.s32.totalorder %s643_s4, %s639_s3 }
  0x74   :  { %p646_p12 = por %p645_p11, %p644_p10 }
  0x76   :  { %p647_p13 = pnand %p646_p12, %p640_p9 }
  0x78   :  { %650 = shalt.err (!%p647_p13)
}
  0x79   :  { %92 = dma.hbm_to_vmem [thread:$0]  %s881_s6, 16, %s90_s29, [#allocation14]  }
  0x7a   :  { %673 = dma.done.wait [#allocation5], 256  }
  0x7b   :  { %674 = vsyncadd [#allocation5], 4294967040 }
  0x7c   :  { %675 = dma.done.wait [#allocation8], 32  }
  0x7d   :  { %676 = vsyncadd [#allocation8], 4294967264 }
  0x7e   :  { %677 = dma.done.wait [#allocation11], 272  }
  0x7f   :  { %678 = vsyncadd [#allocation11], 4294967024 }
  0x80   :  { %679 = dma.done.wait [#allocation14], 1040  }
  0x81   :  { %680 = vsyncadd [#allocation14], 4294966256  ;;  %vm123_vm0 = vcmask 261120   ;;  %v838_v0 = vld [vmem:[#allocation4] sm:$0xff]  ;;  %v840_v1 = vld [vmem:[#allocation4 + $0x8] sm:$0xff]  ;;  %v694_v15 = vmov 0.0  }
  0x82   :  { %v124_v2 = vsel %vm123_vm0, %v838_v0, 0.0  ;;  %v127_v3 = vsel %vm123_vm0, %v840_v1, 0.0  ;;  %v479_v14 = vld [vmem:[#allocation10] sm:$0xff]   ;;  %437 = vmatprep.subr.bf16.mxu0 %v694_v15  ;;  %169 = vst.msk [vmem:[#allocation3] sm:$0xff] %vm123_vm0, %v694_v15  ;;  %170 = vst.msk [vmem:[#allocation3 + $0x8] sm:$0xff] %vm123_vm0, %v694_v15  ;;  %445 = vmatprep.subr.bf16.mxu1 %v694_v15  ;;  %v480_v16 = vld [vmem:[#allocation10 + $0x8] sm:$0xff]  }
  0x83   :  { %125 = vadd.xlane.f32.xlu0 %v124_v2  ;;  %438 = vmatpush3.bf16.msra.mxu0 %v479_v14  ;;  %vm695_vm1 = vmmov 0   ;;  %v410_v25 = vld [vmem:[#allocation7] ss:$0 sm:$0xff]  ;;  %v411_v29 = vld [vmem:[#allocation9] ss:$0 sm:$0xff]  ;;  %v481_v35 = vld [vmem:[#allocation13] sm:$0xff]  }
  0x84   :  { %441 = vmatprep.mubr.msk.bf16.mxu0 %vm695_vm1, %v694_v15  ;;  %439 = vmatprep.subr.bf16.mxu0 %v694_v15  ;;  %v482_v36 = vld [vmem:[#allocation13 + $0x8] sm:$0xff]   ;;  %v483_v37 = vld [vmem:[#allocation13 + $0x10] sm:$0xff]   ;;  %v484_v38 = vld [vmem:[#allocation13 + $0x18] sm:$0xff]   ;;  %s696_s6 = smov [#allocation16]  }
  0x85   :  { %461 = vmatprep.mubr.msk.bf16.mxu1 %vm695_vm1, %v694_v15  ;;  %446 = vmatpush3.bf16.msra.mxu1 %v481_v35  ;;  %v485_v39 = vld [vmem:[#allocation13 + $0x20] sm:$0xff]   ;;  %v486_v40 = vld [vmem:[#allocation13 + $0x28] sm:$0xff]   ;;  %v487_v41 = vld [vmem:[#allocation13 + $0x30] sm:$0xff]   ;;  %s395_s8 = sshll.u32 %s696_s6, 4  ;;  %s396_s8 = int_to_ptr.vmem [resolvable:$true] %s395_s8 }
  0x86   :  { %447 = vmatprep.subr.bf16.mxu1 %v694_v15  ;;  %v488_v42 = vld [vmem:[#allocation13 + $0x38] sm:$0xff]   ;;  %s651_s27 = scalar_lea.vmem %s396_s8, 256  ;;  %p656_p1 = scmp.lt.s32.totalorder %s396_s8, %s396_s8 }
  0x87   :  { %128 = vadd.xlane.f32.xlu0 %v127_v3  ;;  %440 = vmatpush3.bf16.msra.mxu0 %v480_v16  ;;  %v412_v43 = vld [vmem:[#allocation12] ss:$0 sm:$0xff]  ;;  %v424_v16 = vld [vmem:[#allocation15] ss:$0 sm:$0xff]  ;;  %p652_p0 = scmp.ne.s32.totalorder %s396_s8, %s651_s27  ;;  %p657_p2 = scmp.lt.s32.totalorder %s651_s27, %s651_s27 }
  0x89   :  { %448 = vmatpush3.bf16.msra.mxu1 %v482_v36  ;;  %p658_p3 = por %p657_p2, %p656_p1 }
  0x8a   :  { %449 = vmatprep.subr.bf16.mxu1 %v694_v15 }
  0x8b   :  { %p659_p4 = pnand %p658_p3, %p652_p0 }
  0x8d   :  { %450 = vmatpush3.bf16.msra.mxu1 %v483_v37 }
  0x8e   :  { %451 = vmatprep.subr.bf16.mxu1 %v694_v15 }
  0x91   :  { %452 = vmatpush3.bf16.msra.mxu1 %v484_v38 }
  0x92   :  { %453 = vmatprep.subr.bf16.mxu1 %v694_v15 }
  0x95   :  { %454 = vmatpush3.bf16.msra.mxu1 %v485_v39 }
  0x96   :  { %455 = vmatprep.subr.bf16.mxu1 %v694_v15 }
  0x99   :  { %456 = vmatpush3.bf16.msra.mxu1 %v486_v40 }
  0x9a   :  { %457 = vmatprep.subr.bf16.mxu1 %v694_v15 }
  0x9d   :  { %458 = vmatpush3.bf16.msra.mxu1 %v487_v41 }
  0x9e   :  { %459 = vmatprep.subr.bf16.mxu1 %v694_v15 }
  0xa1   :  { %460 = vmatpush3.bf16.msra.mxu1 %v488_v42 }
 0x110   :  { %v126_v4 = vpop.xlane.xlu0 %125 }
 0x111   :  { %v131_v5 = vmul.f32 0.03125, %v126_v4 }
 0x113   :  { %v133_v6 = vsub.f32 %v838_v0, %v131_v5 }
 0x114   :  { %v129_v7 = vpop.xlane.xlu0 %128 }
 0x115   :  { %v132_v8 = vmul.f32 0.03125, %v129_v7  ;;  %v135_v9 = vmul.f32 %v133_v6, %v133_v6  ;;  %v258_v7 = vld [vmem:[#allocation3] sm:$0xff] }
 0x117   :  { %v134_v10 = vsub.f32 %v840_v1, %v132_v8  ;;  %v137_v11 = vsel %vm123_vm0, %v135_v9, 0.0  ;;  %v259_v9 = vld [vmem:[#allocation3 + $0x8] sm:$0xff] }
 0x118   :  { %138 = vadd.xlane.f32.xlu1 %v137_v11 }
 0x119   :  { %v136_v12 = vmul.f32 %v134_v10, %v134_v10 }
 0x11b   :  { %v140_v13 = vsel %vm123_vm0, %v136_v12, 0.0 }
 0x11c   :  { %141 = vadd.xlane.f32.xlu1 %v140_v13 }
 0x1a5   :  { %v139_v17 = vpop.xlane.xlu1 %138 }
 0x1a6   :  { %v143_v18 = vmul.f32 0.03125, %v139_v17 }
 0x1a8   :  { %v145_v19 = vadd.f32 1e-05, %v143_v18 }
 0x1a9   :  { %v142_v20 = vpop.xlane.xlu1 %141 }
 0x1aa   :  { %489 = vrsqrt.f32 %v145_v19  ;;  %v144_v21 = vmul.f32 0.03125, %v142_v20 }
 0x1ac   :  { %v146_v22 = vadd.f32 1e-05, %v144_v21 }
 0x1ae   :  { %491 = vrsqrt.f32 %v146_v22 }
 0x1b4   :  { %v490_v23 = vpop.eup %489 }
 0x1b5   :  { %v149_v24 = vmul.f32 %v490_v23, %v133_v6 }
 0x1b7   :  { %v157_v27 = vmul.f32 %v410_v25, %v149_v24 }
 0x1b8   :  { %v492_v26 = vpop.eup %491 }
 0x1b9   :  { %v150_v28 = vmul.f32 %v492_v26, %v134_v10  ;;  %v165_v31 = vadd.f32 %v411_v29, %v157_v27 }
 0x1bb   :  { %v158_v30 = vmul.f32 %v410_v25, %v150_v28 }
 0x1bd   :  { %v166_v32 = vadd.f32 %v411_v29, %v158_v30 }
 0x1bf   :  { %v167_v33 = vpack.c.bf16 %v166_v32, %v165_v31 }
 0x1c1   :  { %168 = vst.msk [vmem:[#allocation2] sm:$0xff] %vm123_vm0, %v167_v33 }
 0x1c8   :  { %v171_v34 = vld [vmem:[#allocation2] sm:$0xff] }
 0x1c9   :  { %442 = vmatmul.mubr.msk.bf16.vlgmr.msra.gmra.mrb[0].mxu0 %vm123_vm0, %v171_v34 }
 0x29c   :  { %v233_v44 = vpop.f32.mrb[0].mxu0 }
 0x29d   :  { %v234_v45 = vadd.f32 %v412_v43, %v233_v44  ;;  %v443_v46 = vpop.f32.mrb[1].mxu0 }
 0x29e   :  { %v236_v47 = vpop.f32.mrb[2].mxu0 }
 0x29f   :  { %v242_v48 = vmul.f32 %v234_v45, %v234_v45  ;;  %v237_v49 = vadd.f32 %v412_v43, %v236_v47  ;;  %v444_v50 = vpop.f32.mrb[3].mxu0  ;;  %v240_v63 = vmul.f32 0.5, %v234_v45 }
 0x2a1   :  { %v244_v51 = vmul.f32 %v242_v48, %v234_v45  ;;  %v243_v52 = vmul.f32 %v237_v49, %v237_v49  ;;  %v241_v2 = vmul.f32 0.5, %v237_v49 }
 0x2a3   :  { %v246_v53 = vmul.f32 0.044715, %v244_v51  ;;  %v245_v54 = vmul.f32 %v243_v52, %v237_v49 }
 0x2a5   :  { %v248_v55 = vadd.f32 %v246_v53, %v234_v45  ;;  %v247_v56 = vmul.f32 0.044715, %v245_v54 }
 0x2a7   :  { %v250_v57 = vmul.f32 0.7978846, %v248_v55  ;;  %v249_v58 = vadd.f32 %v247_v56, %v237_v49 }
 0x2a9   :  { %493 = vtanh.f32 %v250_v57  ;;  %v251_v59 = vmul.f32 0.7978846, %v249_v58 }
 0x2ab   :  { %495 = vtanh.f32 %v251_v59 }
 0x2b3   :  { %v494_v60 = vpop.eup %493 }
 0x2b4   :  { %v254_v61 = vadd.f32 1.0, %v494_v60 }
 0x2b5   :  { %v496_v62 = vpop.eup %495 }
 0x2b6   :  { %v255_v3 = vadd.f32 1.0, %v496_v62  ;;  %v256_v4 = vmul.f32 %v254_v61, %v240_v63 }
 0x2b8   :  { %v257_v5 = vmul.f32 %v255_v3, %v241_v2 }
 0x2ba   :  { %v260_v6 = vpack.c.bf16 %v257_v5, %v256_v4 }
 0x2bc   :  { %462 = vmatmul.mubr.bf16.vlgmr.msra.gmra.mrb[0].mxu1 %v260_v6 }
 0x38f   :  { %v359_v8 = vpop.f32.mrb[0].mxu1 }
 0x390   :  { %v366_v10 = vadd.f32 %v359_v8, %v258_v7  ;;  %v463_v11 = vpop.f32.mrb[1].mxu1 }
 0x391   :  { %v362_v12 = vpop.f32.mrb[2].mxu1 }
 0x392   :  { %368 = vst.msk [vmem:[#allocation3] sm:$0xff] %vm123_vm0, %v366_v10  ;;  %v367_v13 = vadd.f32 %v362_v12, %v259_v9  ;;  %v464_v14 = vpop.f32.mrb[3].mxu1 }
 0x394   :  { %369 = vst.msk [vmem:[#allocation3 + $0x8] sm:$0xff] %vm123_vm0, %v367_v13 }
 0x399   :  { %v375_v15 = vld [vmem:[#allocation3] sm:$0xff] }
 0x39a   :  { %v377_v17 = vadd.f32 %v375_v15, %v838_v0 }
 0x39b   :  { %v376_v18 = vld [vmem:[#allocation3 + $0x8] sm:$0xff] }
 0x39c   :  { %v378_v19 = vadd.f32 %v376_v18, %v840_v1  ;;  %v386_v20 = vadd.f32 %v424_v16, %v377_v17 }
 0x39e   :  { %v387_v21 = vadd.f32 %v424_v16, %v378_v19  ;;  %388 = vst.msk [vmem:[#allocation16] sm:$0xff] %vm123_vm0, %v386_v20 }
 0x3a0   :  { %389 = vst.msk [vmem:[#allocation16 + $0x8] sm:$0xff] %vm123_vm0, %v387_v21 }
 0x3a1   :  { %662 = shalt.err (!%p659_p4)
}
 0x3a2   :  { %s663_s18 = scalar_lea.hbm %s882_s7, 256 }
 0x3a3   :  { %p664_p5 = scmp.ne.s32.totalorder %s882_s7, %s663_s18  ;;  %p667_p6 = scmp.lt.u32.totalorder %s663_s18, %s882_s7 }
 0x3a5   :  { %p669_p7 = pnand %p667_p6, %p664_p5 }
 0x3a7   :  { %672 = shalt.err (!%p669_p7)
}
 0x3a8   :  { %401 = dma.vmem_to_hbm [thread:$0]  %s396_s8, 256, %s882_s7, [#allocation6], %s689_s5, %s689_s5, %s690_s1  }
 0x3a9   :  { %681 = dma.done.wait [#allocation6], 256  }
 0x3aa   :  { %682 = vsyncadd [#allocation6], 4294967040 }
 0x3ab   :  { %405 = vsyncpa [#allocation5], 1 }
 0x3ac   :  { %406 = vsyncpa [#allocation8], 1 }
 0x3ad   :  { %407 = vsyncpa [#allocation11], 1 }
 0x3ae   :  { %408 = vsyncpa [#allocation14], 1 }
 0x3af   :  { %409 = vsyncpa [#allocation6], 1 }

// kernel: transformer_forward.5
= control target key start
LH: loop header
LB: loop body
LE: loop exit
PB: predicated region body
PF: predicated region fallthrough
CT: control target
= control target key end

     0   :  { %s2277_s0 = inlined_call_operand.hbm [shape: f32[2,8,32], index: 0, kind: input, shape index: {}, may-alias: {0,7}]   ;;  %s2278_s1 = inlined_call_operand.hbm [shape: f32[1,32], index: 1, kind: input, shape index: {}]   ;;  %s2279_s2 = inlined_call_operand.hbm [shape: f32[1,32], index: 2, kind: input, shape index: {}]   ;;  %s2280_s3 = inlined_call_operand.hbm [shape: bf16[1,32,96], index: 3, kind: input, shape index: {}]   ;;  %s2281_s4 = inlined_call_operand.hbm [shape: f32[1,1,96], index: 4, kind: input, shape index: {}]   ;;  %s2282_s5 = inlined_call_operand.hbm [shape: bf16[1,32,32], index: 5, kind: input, shape index: {}]   ;;  %s2283_s6 = inlined_call_operand.hbm [shape: f32[1,32], index: 6, kind: input, shape index: {}]   ;;  %s2284_s7 = inlined_call_operand.hbm [shape: f32[2,8,32], index: 7, kind: output, shape index: {}, may-alias: {0,7}]  }
   0x1   :  { %2290 = sst [smem:[#allocation22_spill]] %s2278_s1 }
   0x2   :  { %2291 = sst [smem:[#allocation23_spill]] %s2280_s3 }
   0x3   :  { %12 = vsyncpa [#allocation5], 0 }
   0x4   :  { %14 = vsyncpa [#allocation5 + $0x1], 0 }
   0x5   :  { %15 = vsyncpa [#allocation8], 0 }
   0x6   :  { %16 = vsyncpa [#allocation11], 0 }
   0x7   :  { %17 = vsyncpa [#allocation14], 0 }
   0x8   :  { %18 = vsyncpa [#allocation6], 0 }
   0x9   :  { %20 = vsyncpa [#allocation6 + $0x1], 0  ;;  %s1861_s24 = smov 0   ;;  %s1863_s25 = smov 0  }
   0xa   :  { %s1865_s26 = smov 0   ;;  %s1867_s27 = smov 0  }
   0xb   :  { %s1869_s28 = smov 0   ;;  %s1871_s29 = smov 0  }
   0xc LB: > { %s2288_s30 = sadd.s32 4294967295, %s1793_s29   ;;  %p1211_p0 = scmp.ge.s32.totalorder %s1793_s29, 1  ;;  %s1793_s29 = sphi %s1871_s29, %s26_s29   ;;  %s1789_s28 = sphi %s1869_s28, %s2314_s28   ;;  %s1785_s27 = sphi %s1867_s27, %s2313_s27   ;;  %s1781_s26 = sphi %s1865_s26, %s2312_s26   ;;  %s1777_s25 = sphi %s1863_s25, %s2311_s25   ;;  %s1773_s24 = sphi %s1861_s24, %s2310_s24  }
   0xd   : > { %p1895_p1 = scmp.eq.s32.totalorder %s2288_s30, 0  ;;  %p236_p2 = scmp.lt.s32.totalorder %s1793_s29, 3 }
   0xe   : > { %s1795_s10 = smov [#allocation7]   ;;  %s1796_s12 = smov [#allocation10]  }
   0xf   : > { %s2292_s8 = scalar_select %p1895_p1, 1, 0 }
  0x10   : > { %p1900_p3 = pnand %p1211_p0, %p236_p2  ;;  %s249_s11 = sshll.u32 %s1795_s10, 4  ;;  %s250_s11 = int_to_ptr.vmem [resolvable:$true] %s249_s11 }
  0x11   : > { %s273_s13 = sshll.u32 %s1796_s12, 4  ;;  %s1797_s15 = smov [#allocation13]   ;;  %s1913_s13 = int_to_ptr.vmem [resolvable:$true] %s273_s13 }
  0x12   : > { %s2293_s9 = scalar_select %p1900_p3, 1, 0 }
  0x13   : > { %p1366_p5 = pneg %p1900_p3  ;;  %s1915_s16 = sshll.u32 %s1797_s15, 4  ;;  %s303_s16 = int_to_ptr.vmem [resolvable:$true] %s1915_s16 }
  0x14   : > { %s2295_s1 = sld [smem:[#allocation22_spill]] }
  0x15   : > { %p1909_p6 = pnand %p1366_p5, %p1895_p1 }
  0x17   : > { %p1925_p8 = pneg %p1909_p6 }
  0x1a   : > { %s1501_s19 = scalar_lea.hbm %s2295_s1, 16 }
  0x1b   : > { %p1502_p7 = scmp.ne.s32.totalorder %s2295_s1, %s1501_s19  ;;  %p1508_p11 = scmp.lt.u32.totalorder %s1501_s19, %s2295_s1 }
  0x1d   : > { %p1504_p9 = pnand %p1925_p8, %p1502_p7 }
  0x1f   : > { %p1505_p10 = pneg %p1504_p9 }
  0x21   : > { %p1510_p12 = pnand %p1508_p11, %p1505_p10 }
  0x23   : > { %1513 = shalt.err (!%p1510_p12)
}
  0x24   : > { %s1514_s12 = scalar_lea.vmem %s250_s11, 16  ;;  %s1521_s15 = scalar_lea.vmem %s250_s11, 32 }
  0x25   : > { %p1515_p13 = scmp.ne.s32.totalorder %s250_s11, %s1514_s12  ;;  %p1522_p5 = scmp.lt.s32.totalorder %s250_s11, %s250_s11 }
  0x26   : > { %p1523_p4 = scmp.lt.s32.totalorder %s1521_s15, %s1514_s12 }
  0x27   : > { %p1517_p0 = pnand %p1515_p13, %p1925_p8 }
  0x28   : > { %p1524_p3 = por %p1523_p4, %p1522_p5 }
  0x29   : > { %p1518_p2 = pneg %p1517_p0 }
  0x2b   : > { %p1525_p1 = pnand %p1524_p3, %p1518_p2 }
  0x2d   : > { %1528 = shalt.err (!%p1525_p1)
}
  0x2e   : > { %1369 = dma.hbm_to_vmem [thread:$0]  (!%p1909_p6), %s2295_s1, 16, %s250_s11, [#allocation8]  }
  0x2f   : > { %s2297_s3 = sld [smem:[#allocation23_spill]] }
  0x35   : > { %s1529_s21 = scalar_lea.hbm %s2297_s3, 256 }
  0x36   : > { %p1530_p7 = scmp.ne.s32.totalorder %s2297_s3, %s1529_s21  ;;  %p1536_p1 = scmp.lt.u32.totalorder %s1529_s21, %s2297_s3 }
  0x38   : > { %p1532_p9 = pnand %p1530_p7, %p1925_p8 }
  0x3a   : > { %p1533_p4 = pneg %p1532_p9 }
  0x3c   : > { %p1538_p3 = pnand %p1536_p1, %p1533_p4 }
  0x3e   : > { %1541 = shalt.err (!%p1538_p3)
}
  0x3f   : > { %s1542_s11 = scalar_lea.vmem %s1913_s13, 256  ;;  %p1550_p13 = scmp.lt.s32.totalorder %s1913_s13, %s1913_s13 }
  0x40   : > { %p1543_p10 = scmp.ne.s32.totalorder %s1913_s13, %s1542_s11  ;;  %p1551_p0 = scmp.lt.s32.totalorder %s1542_s11, %s1542_s11 }
  0x42   : > { %p1545_p11 = pnand %p1543_p10, %p1925_p8  ;;  %p1552_p2 = por %p1551_p0, %p1550_p13 }
  0x44   : > { %p1546_p12 = pneg %p1545_p11 }
  0x46   : > { %p1553_p5 = pnand %p1552_p2, %p1546_p12 }
  0x48   : > { %1556 = shalt.err (!%p1553_p5)
}
  0x49   : > { %s1798_s17 = smov 64   ;;  %s1799_s18 = smov 4  }
  0x4a   : > { %1375 = dma.hbm_to_vmem [thread:$0]  (!%p1909_p6), %s2297_s3, 256, %s1913_s13, [#allocation11], %s1798_s17, %s1798_s17, %s1799_s18  }
  0x4b   : > { %s1557_s10 = scalar_lea.hbm %s2282_s5, 256 }
  0x4c   : > { %p1558_p7 = scmp.ne.s32.totalorder %s2282_s5, %s1557_s10  ;;  %p1564_p1 = scmp.lt.u32.totalorder %s1557_s10, %s2282_s5 }
  0x4e   : > { %p1560_p9 = pnand %p1558_p7, %p1925_p8 }
  0x50   : > { %p1561_p4 = pneg %p1560_p9 }
  0x52   : > { %p1566_p3 = pnand %p1564_p1, %p1561_p4 }
  0x54   : > { %1569 = shalt.err (!%p1566_p3)
}
  0x55   : > { %s1570_s19 = scalar_lea.vmem %s303_s16, 256  ;;  %p1578_p13 = scmp.lt.s32.totalorder %s303_s16, %s303_s16 }
  0x56   : > { %p1571_p10 = scmp.ne.s32.totalorder %s303_s16, %s1570_s19  ;;  %p1579_p0 = scmp.lt.s32.totalorder %s1570_s19, %s1570_s19 }
  0x58   : > { %p1573_p11 = pnand %p1571_p10, %p1925_p8  ;;  %p1580_p2 = por %p1579_p0, %p1578_p13 }
  0x5a   : > { %p1574_p12 = pneg %p1573_p11 }
  0x5c   : > { %p1581_p5 = pnand %p1580_p2, %p1574_p12 }
  0x5e   : > { %1584 = shalt.err (!%p1581_p5)
}
  0x5f   : > { %1381 = dma.hbm_to_vmem [thread:$0]  (!%p1909_p6), %s2282_s5, 256, %s303_s16, [#allocation14], %s1798_s17, %s1798_s17, %s1799_s18  }
  0x60   : > { %s1800_s30 = smov [#allocation9]   ;;  %s1801_s23 = smov [#allocation12]  }
  0x61   : > { %s260_s21 = sshll.u32 %s1800_s30, 4  ;;  %s289_s10 = sshll.u32 %s1801_s23, 4  ;;  %s261_s21 = int_to_ptr.vmem [resolvable:$true] %s260_s21  ;;  %s290_s10 = int_to_ptr.vmem [resolvable:$true] %s289_s10 }
  0x62   : > { %s1585_s11 = scalar_lea.hbm %s2279_s2, 16 }
  0x63   : > { %p1586_p7 = scmp.ne.s32.totalorder %s2279_s2, %s1585_s11  ;;  %p1592_p1 = scmp.lt.u32.totalorder %s1585_s11, %s2279_s2 }
  0x65   : > { %p1588_p9 = pnand %p1586_p7, %p1925_p8 }
  0x67   : > { %p1589_p4 = pneg %p1588_p9 }
  0x69   : > { %p1594_p3 = pnand %p1592_p1, %p1589_p4 }
  0x6b   : > { %1597 = shalt.err (!%p1594_p3)
}
  0x6c   : > { %s1598_s16 = scalar_lea.vmem %s261_s21, 16  ;;  %s1605_s17 = scalar_lea.vmem %s261_s21, 32 }
  0x6d   : > { %p1599_p10 = scmp.ne.s32.totalorder %s261_s21, %s1598_s16  ;;  %p1606_p13 = scmp.lt.s32.totalorder %s261_s21, %s261_s21 }
  0x6e   : > { %p1607_p0 = scmp.lt.s32.totalorder %s1605_s17, %s1598_s16 }
  0x6f   : > { %p1601_p11 = pnand %p1599_p10, %p1925_p8 }
  0x70   : > { %p1608_p2 = por %p1607_p0, %p1606_p13 }
  0x71   : > { %p1602_p12 = pneg %p1601_p11 }
  0x73   : > { %p1609_p5 = pnand %p1608_p2, %p1602_p12 }
  0x75   : > { %1612 = shalt.err (!%p1609_p5)
}
  0x76   : > { %1372 = dma.hbm_to_vmem [thread:$0]  (!%p1909_p6), %s2279_s2, 16, %s261_s21, [#allocation8]  }
  0x77   : > { %s1613_s30 = scalar_lea.hbm %s2281_s4, 16 }
  0x78   : > { %p1614_p7 = scmp.ne.s32.totalorder %s2281_s4, %s1613_s30  ;;  %p1620_p1 = scmp.lt.u32.totalorder %s1613_s30, %s2281_s4 }
  0x7a   : > { %p1616_p9 = pnand %p1614_p7, %p1925_p8 }
  0x7c   : > { %p1617_p4 = pneg %p1616_p9 }
  0x7e   : > { %p1622_p3 = pnand %p1620_p1, %p1617_p4 }
  0x80   : > { %1625 = shalt.err (!%p1622_p3)
}
  0x81   : > { %s1626_s19 = scalar_lea.vmem %s290_s10, 16  ;;  %s1633_s21 = scalar_lea.vmem %s290_s10, 32 }
  0x82   : > { %p1627_p10 = scmp.ne.s32.totalorder %s290_s10, %s1626_s19  ;;  %p1634_p13 = scmp.lt.s32.totalorder %s290_s10, %s290_s10 }
  0x83   : > { %p1635_p0 = scmp.lt.s32.totalorder %s1633_s21, %s1626_s19 }
  0x84   : > { %p1629_p11 = pnand %p1627_p10, %p1925_p8 }
  0x85   : > { %p1636_p2 = por %p1635_p0, %p1634_p13 }
  0x86   : > { %p1630_p12 = pneg %p1629_p11 }
  0x88   : > { %p1637_p5 = pnand %p1636_p2, %p1630_p12 }
  0x8a   : > { %1640 = shalt.err (!%p1637_p5)
}
  0x8b   : > { %1378 = dma.hbm_to_vmem [thread:$0]  (!%p1909_p6), %s2281_s4, 16, %s290_s10, [#allocation11]  }
  0x8c   : > { %s1802_s17 = smov [#allocation15]   ;;  %s1641_s20 = scalar_lea.hbm %s2283_s6, 16 }
  0x8d   : > { %s316_s1 = sshll.u32 %s1802_s17, 4  ;;  %p1642_p7 = scmp.ne.s32.totalorder %s2283_s6, %s1641_s20  ;;  %s317_s1 = int_to_ptr.vmem [resolvable:$true] %s316_s1 }
  0x8e   : > { %p1648_p1 = scmp.lt.u32.totalorder %s1641_s20, %s2283_s6 }
  0x8f   : > { %p1644_p9 = pnand %p1642_p7, %p1925_p8 }
  0x91   : > { %p1645_p4 = pneg %p1644_p9 }
  0x93   : > { %p1650_p3 = pnand %p1648_p1, %p1645_p4 }
  0x95   : > { %1653 = shalt.err (!%p1650_p3)
}
  0x96   : > { %s1654_s10 = scalar_lea.vmem %s317_s1, 16  ;;  %s1661_s11 = scalar_lea.vmem %s317_s1, 32 }
  0x97   : > { %p1655_p10 = scmp.ne.s32.totalorder %s317_s1, %s1654_s10  ;;  %p1662_p13 = scmp.lt.s32.totalorder %s317_s1, %s317_s1 }
  0x98   : > { %p1663_p0 = scmp.lt.s32.totalorder %s1661_s11, %s1654_s10 }
  0x99   : > { %p1657_p11 = pnand %p1655_p10, %p1925_p8 }
  0x9a   : > { %p1664_p2 = por %p1663_p0, %p1662_p13 }
  0x9b   : > { %p1658_p12 = pneg %p1657_p11 }
  0x9d   : > { %p1665_p5 = pnand %p1664_p2, %p1658_p12 }
  0x9f   : > { %1668 = shalt.err (!%p1665_p5)
}
  0xa0   : > { %1384 = dma.hbm_to_vmem [thread:$0]  (!%p1909_p6), %s2283_s6, 16, %s317_s1, [#allocation14]  }
  0xa1   : > { %s1210_s22 = sadd.s32 4294967294, %s1793_s29   ;;  %s38_s13 = sadd.s32 1, %s1789_s28 }
  0xa2   : > { %p40_p8 = scmp.ge.s32.totalorder %s38_s13, 2  ;;  %s45_s14 = sadd.s32 1, %s1781_s26 }
  0xa3   : > { %p52_p7 = scmp.ne.s32.totalorder %s1781_s26, %s1777_s25  ;;  %p53_p9 = scmp.eq.s32.totalorder %s1793_s29, 0 }
  0xa4   : > { %s2316_s13 = smov (%p40_p8, %s38_s13), 0  ;;  %p58_p1 = scmp.ne.s32.totalorder %s1777_s25, %s1773_s24 }
  0xa5   : > { %p2045_p4 = por %p53_p9, %p52_p7  ;;  %s42_s17 = ssub.s32 %s1789_s28, %s2316_s13 }
  0xa6   : > { %s2299_s1 = sadd.s32 4294967295, %s1793_s29   ;;  %p43_p3 = scmp.eq.s32.totalorder %s42_s17, 0 }
  0xa7   : > { %p223_p6 = scmp.eq.s32.totalorder %s2299_s1, 1  ;;  %p2300_p10 = scmp.ne.s32.totalorder %s2292_s8, 0 }
  0xa8   : > { %p229_p13 = scmp.eq.s32.totalorder %s1210_s22, 1  ;;  %p1399_p2 = scmp.lt.s32.totalorder %s1793_s29, 2 }
  0xa9   : > { %p2057_p11 = por %p2300_p10, %p58_p1  ;;  %p2061_p12 = por %p223_p6, %p52_p7 }
  0xaa   : > { %s2066_s20 = scalar_select %p43_p3, %s1781_s26, %s45_s14  }
  0xab   : > { %s2302_s3 = scalar_select %p2061_p12, 1, 0 }
  0xac   : > { %p2068_p0 = por %p229_p13, %p58_p1  ;;  %s327_s23 = sand.u32 1, %s1781_s26  }
  0xad   : > { %s1220_s12 = sshll.u32 %s1789_s28, 7  ;;  %s1219_s15 = sshll.u32 %s327_s23, 3 }
  0xae   : > { %s2303_s30 = scalar_select %p2068_p0, 1, 0 }
  0xaf   : > { %s2078_s19 = scalar_lea.hbm %s2277_s0, %s1220_s12  ;;  %s331_s21 = scalar_lea.vmem [#allocation4], %s1219_s15 }
  0xb0   : > { %s338_s22 = sshll.u32 %s331_s21, 4  ;;  %p2082_p5 = pnand %p1399_p2, %p2045_p4  ;;  %s2086_s22 = int_to_ptr.vmem [resolvable:$true] %s338_s22 }
  0xb1   : > { %s328_s17 = scalar_lea.sflag [#allocation5], %s327_s23  ;;  %s1669_s1 = scalar_lea.hbm %s2078_s19, 128 }
  0xb2   : > { %p1670_p8 = scmp.ne.s32.totalorder %s2078_s19, %s1669_s1  ;;  %p1671_p7 = pneg %p2082_p5 }
  0xb3   : > { %s1674_s16 = scalar_lea.hbm %s2277_s0, 256  ;;  %p1675_p4 = scmp.lt.u32.totalorder %s2078_s19, %s2277_s0 }
  0xb4   : > { %p1672_p9 = pnand %p1671_p7, %p1670_p8  ;;  %p1676_p6 = scmp.lt.u32.totalorder %s1674_s16, %s1669_s1 }
  0xb5   : > { %p1678_p10 = scmp.lt.u32.totalorder %s1669_s1, %s2078_s19 }
  0xb6   : > { %p1673_p1 = pneg %p1672_p9  ;;  %p1677_p3 = por %p1676_p6, %p1675_p4 }
  0xb8   : > { %p1679_p13 = por %p1678_p10, %p1677_p3 }
  0xba   : > { %p1680_p2 = pnand %p1679_p13, %p1673_p1 }
  0xbc   : > { %1683 = shalt.err (!%p1680_p2)
}
  0xbd   : > { %s1684_s23 = scalar_lea.vmem %s2086_s22, 128  ;;  %s1803_s21 = smov [#allocation4]  }
  0xbe   : > { %p1685_p8 = scmp.ne.s32.totalorder %s2086_s22, %s1684_s23  ;;  %s1689_s12 = sshll.u32 %s1803_s21, 4  ;;  %s1690_s12 = int_to_ptr.vmem [resolvable:$false] %s1689_s12 }
  0xbf   : > { %s1691_s15 = scalar_lea.vmem %s1690_s12, 256  ;;  %p1692_p12 = scmp.lt.s32.totalorder %s2086_s22, %s1690_s12 }
  0xc0   : > { %p1687_p9 = pnand %p1685_p8, %p1671_p7  ;;  %p1693_p4 = scmp.lt.s32.totalorder %s1691_s15, %s1684_s23 }
  0xc2   : > { %p1688_p0 = pneg %p1687_p9  ;;  %p1694_p6 = por %p1693_p4, %p1692_p12 }
  0xc4   : > { %p1695_p3 = pnand %p1694_p6, %p1688_p0 }
  0xc6   : > { %1698 = shalt.err (!%p1695_p3)
}
  0xc7   : > { %1388 = dma.hbm_to_vmem [thread:$0]  (!%p2082_p5), %s2078_s19, 128, %s2086_s22, %s328_s17  }
  0xc8   : > { %p2305_p1 = scmp.ne.s32.totalorder %s2293_s9, 0 }
  0xc9   : > { %s2116_s1 = sand.u32 (!%p2305_p1), 1, %s1777_s25  }
  0xca   : > { %347 = sbr.rel (%p2305_p1) target bundleno = 2039 (0x7f7), region = 48  ;;  %s1222_s16 = sshll.u32 (!%p2305_p1), %s2116_s1, 3 }
  0xcb   : > { %s350_s10 = scalar_lea.sflag (!%p2305_p1), [#allocation5], %s2116_s1  ;;  %s353_s11 = scalar_lea.vmem (!%p2305_p1), [#allocation4], %s1222_s16 }
  0xd1   : > { %1752 = dma.done.wait (%p2057_p11), %s350_s10, 128  }
  0xd2   : > { %1754 = vsyncadd (%p2057_p11), %s350_s10, 4294967168  ;;  %p2306_p12 = scmp.ne.s32.totalorder %s2292_s8, 0 }
  0xd4   : > { %1756 = dma.done.wait (%p2306_p12), [#allocation8], 32  }
  0xd5   : > { %1758 = vsyncadd (%p2306_p12), [#allocation8], 4294967264 }
  0xd6   : > { %1760 = dma.done.wait (%p2306_p12), [#allocation11], 272  }
  0xd7   : > { %1762 = vsyncadd (%p2306_p12), [#allocation11], 4294967024 }
  0xd8   : > { %1764 = dma.done.wait (%p2306_p12), [#allocation14], 272  }
  0xd9   : > { %1766 = vsyncadd (%p2306_p12), [#allocation14], 4294967024  ;;  %vm416_vm0 = vcmask 261120   ;;  %v2138_v0 = vld [vmem:[%s353_s11] sm:$0xff]  ;;  %v1479_v7 = vld [vmem:[#allocation10] sm:$0xff]   ;;  %v1804_v8 = vmov 0.0  }
  0xda   : > { %v417_v1 = vsel %vm416_vm0, %v2138_v0, 0.0  ;;  %1274 = vmatprep.subr.bf16.mxu0 %v1804_v8  ;;  %448 = vst.msk [vmem:[#allocation3] sm:$0xff] %vm416_vm0, %v1804_v8  ;;  %1282 = vmatprep.subr.bf16.mxu1 %v1804_v8  ;;  %v1480_v9 = vld [vmem:[#allocation10 + $0x8] sm:$0xff]   ;;  %vm1805_vm1 = vmmov 0   ;;  %v1230_v14 = vld [vmem:[#allocation7] ss:$0 sm:$0xff] }
  0xdb   : > { %418 = vadd.xlane.f32.xlu0 %v417_v1  ;;  %1275 = vmatpush3.bf16.msra.mxu0 %v1479_v7  ;;  %v1231_v16 = vld [vmem:[#allocation9] ss:$0 sm:$0xff]  ;;  %vm446_vm2 = vcmask 257024   ;;  %v1232_v21 = vld [vmem:[#allocation12] ss:$0 sm:$0xff]  ;;  %s1806_s8 = smov 120  }
  0xdc   : > { %1278 = vmatprep.mubr.msk.bf16.mxu0 %vm1805_vm1, %v1804_v8  ;;  %1276 = vmatprep.subr.bf16.mxu0 %v1804_v8  ;;  %s1807_s9 = smov 96   ;;  %s1808_s18 = smov 88   ;;  %vm521_vm3 = vcmask 64512   ;;  %vm585_vm4 = vcmask 1043456   ;;  %vm972_vm5 = vcmask 130048   ;;  %vm974_vm6 = vcmask 195584  }
  0xdd   : > { %1284 = vmatprep.mubr.msk.bf16.mxu1 %vm1805_vm1, %v1804_v8  ;;  %s1809_s19 = smov 80   ;;  %s1810_s22 = smov 112  }
  0xde   : > { %s1811_s14 = smov 72   ;;  %s1812_s17 = smov 104  }
  0xdf   : > { %1277 = vmatpush3.bf16.msra.mxu0 %v1480_v9  ;;  %s1813_s23 = smov 64   ;;  %s1814_s21 = smov 56  }
  0xe0   : > { %1288 = vmatprep.subr.bf16.mxu0 %v1804_v8  ;;  %s1815_s12 = smov 48   ;;  %s1816_s15 = smov 40  }
  0xe1   : > { %s1817_s10 = smov 8   ;;  %s1818_s11 = smov 16  }
  0xe2   : > { %p2307_p0 = scmp.ne.s32.totalorder %s2302_s3, 0 }
 0x168   : > { %v419_v2 = vpop.xlane.xlu0 %418 }
 0x169   : > { %v421_v3 = vmul.f32 0.03125, %v419_v2 }
 0x16b   : > { %v422_v4 = vsub.f32 %v2138_v0, %v421_v3 }
 0x16d   : > { %v423_v5 = vmul.f32 %v422_v4, %v422_v4 }
 0x16f   : > { %v424_v6 = vsel %vm416_vm0, %v423_v5, 0.0 }
 0x170   : > { %425 = vadd.xlane.f32.xlu0 %v424_v6 }
 0x1fd   : > { %v426_v10 = vpop.xlane.xlu0 %425 }
 0x1fe   : > { %v427_v11 = vmul.f32 0.03125, %v426_v10 }
 0x200   : > { %v428_v12 = vadd.f32 1e-05, %v427_v11 }
 0x202   : > { %1483 = vrsqrt.f32 %v428_v12 }
 0x20c   : > { %v1484_v13 = vpop.eup %1483 }
 0x20d   : > { %v430_v15 = vmul.f32 %v1484_v13, %v422_v4 }
 0x20f   : > { %v437_v17 = vmul.f32 %v1230_v14, %v430_v15 }
 0x211   : > { %v444_v18 = vadd.f32 %v1231_v16, %v437_v17 }
 0x213   : > { %v445_v19 = vpack.c.bf16 %v444_v18, %v444_v18 }
 0x215   : > { %447 = vst.msk [vmem:[#allocation2] sm:$0xf] %vm446_vm2, %v445_v19 }
 0x21c   : > { %v449_v20 = vld [vmem:[#allocation2] sm:$0xf] }
 0x21d   : > { %1279 = vmatmul.mubr.msk.bf16.vlgmr.msra.gmra.mrb[0].mxu0 %vm416_vm0, %v449_v20 }
 0x21e   : > { %1290 = vmatprep.mubr.msk.bf16.mxu0 %vm1805_vm1, %v1804_v8 }
 0x2f0   : > { %v511_v22 = vpop.f32.mrb[0].mxu0 }
 0x2f1   : > { %v512_v23 = vadd.f32 %v1232_v21, %v511_v22  ;;  %v1280_v24 = vpop.f32.mrb[1].mxu0 }
 0x2f2   : > { %v514_v25 = vpop.f32.mrb[2].mxu0 }
 0x2f3   : > { %v2157_v26 = vpack.c.bf16 %v512_v23, %v512_v23  ;;  %v1281_v27 = vpop.f32.mrb[3].mxu0 }
 0x2f5   : > { %629 = vrot.lane.b32.xlu0 %v2157_v26, %s1806_s8  ;;  %519 = vrot.lane.b32.xlu1 %v2157_v26, %s1807_s9  ;;  %s1819_s8 = smov 24   ;;  %s1249_s9 = sshll.u32 %s1785_s27, 7 }
 0x2f9   : > { %631 = vrot.lane.b32.xlu1 %v2157_v26, %s1808_s18  ;;  %s407_s18 = scalar_lea.vmem [#allocation16], %s1222_s16  ;;  %s1820_s16 = smov [#allocation16]  }
 0x2fd   : > { %741 = vrot.lane.b32.xlu1 %v2157_v26, %s1809_s19  ;;  %s1068_s19 = sshll.u32 %s407_s18, 4  ;;  %s2229_s19 = int_to_ptr.vmem [resolvable:$true] %s1068_s19 }
 0x2fe   : > { %s1699_s27 = scalar_lea.vmem %s2229_s19, 128 }
 0x2ff   : > { %p1700_p11 = scmp.ne.s32.totalorder %s2229_s19, %s1699_s27 }
 0x301   : > { %739 = vrot.lane.b32.xlu1 %v2157_v26, %s1810_s22  ;;  %p1701_p5 = pnand %p1700_p11, %p2307_p0 }
 0x303   : > { %p1702_p7 = pneg %p1701_p5 }
 0x305   : > { %851 = vrot.lane.b32.xlu1 %v2157_v26, %s1811_s14 }
 0x309   : > { %849 = vrot.lane.b32.xlu1 %v2157_v26, %s1812_s17  ;;  %s2227_s17 = scalar_lea.hbm %s2284_s7, %s1249_s9 }
 0x367   : > { %v520_v28 = vpop.permute.xlu1 %519  ;;  %v630_v33 = vpop.permute.xlu0 %629 }
 0x368   : > { %v526_v29 = vsel %vm521_vm3, %v520_v28, 0 }
 0x369   : > { %1283 = vmatpush3.bf16.xpose.msra.mxu1 %v526_v29 }
 0x36a   : > { %1294 = vmatprep.subr.bf16.mxu1 %v1804_v8 }
 0x36b   : > { %v632_v30 = vpop.permute.xlu1 %631 }
 0x36c   : > { %v637_v31 = vsel %vm521_vm3, %v632_v30, 0 }
 0x36f   : > { %v742_v32 = vpop.permute.xlu1 %741 }
 0x370   : > { %1285 = vmatmul.mubr.msk.bf16.vlgmr.msra.gmra.mrb[0].mxu1 %vm521_vm3, %v2157_v26  ;;  %v747_v35 = vsel %vm521_vm3, %v742_v32, 0 }
 0x371   : > { %1295 = vmatpush3.bf16.xpose.msra.mxu1 %v637_v31  ;;  %1296 = vmatprep.mubr.msk.bf16.mxu1 %vm1805_vm1, %v1804_v8 }
 0x372   : > { %1306 = vmatprep.subr.bf16.mxu1 %v1804_v8 }
 0x373   : > { %v740_v34 = vpop.permute.xlu1 %739 }
 0x377   : > { %v852_v36 = vpop.permute.xlu1 %851 }
 0x378   : > { %1297 = vmatmul.mubr.msk.bf16.vlgmr.msra.gmra.mrb[4].mxu1 %vm521_vm3, %v630_v33  ;;  %v857_v37 = vsel %vm521_vm3, %v852_v36, 0 }
 0x379   : > { %1307 = vmatpush3.bf16.xpose.msra.mxu1 %v747_v35  ;;  %1308 = vmatprep.mubr.msk.bf16.mxu1 %vm1805_vm1, %v1804_v8 }
 0x37a   : > { %1318 = vmatprep.subr.bf16.mxu1 %v1804_v8 }
 0x37b   : > { %v850_v38 = vpop.permute.xlu1 %849 }
 0x380   : > { %1309 = vmatmul.mubr.msk.bf16.vlgmr.msra.gmra.mrb[8].mxu1 %vm521_vm3, %v740_v34 }
 0x381   : > { %1319 = vmatpush3.bf16.xpose.msra.mxu1 %v857_v37  ;;  %1320 = vmatprep.mubr.msk.bf16.mxu1 %vm1805_vm1, %v1804_v8 }
 0x382   : > { %1330 = vmatprep.subr.bf16.mxu1 %v1804_v8 }
 0x388   : > { %1321 = vmatmul.mubr.msk.bf16.vlgmr.msra.gmra.mrb[12].mxu1 %vm521_vm3, %v850_v38 }
 0x389   : > { %1334 = vmatprep.mubr.msk.bf16.mxu1 %vm1805_vm1, %v1804_v8 }
 0x443   : > { %v562_v39 = vpop.f32.mrb[0].mxu1 }
 0x444   : > { %v1286_v40 = vpop.f32.mrb[1].mxu1  ;;  %v568_v41 = vsel %vm521_vm3, %v562_v39, -inf }
 0x445   : > { %569 = vmax.xlane.f32.xlu1 %v568_v41  ;;  %v565_v42 = vpop.f32.mrb[2].mxu1 }
 0x446   : > { %v1287_v43 = vpop.f32.mrb[3].mxu1 }
 0x44b   : > { %v673_v44 = vpop.f32.mrb[4].mxu1 }
 0x44c   : > { %v1298_v45 = vpop.f32.mrb[5].mxu1  ;;  %v679_v46 = vsel %vm521_vm3, %v673_v44, -inf }
 0x44d   : > { %680 = vmax.xlane.f32.xlu0 %v679_v46  ;;  %v676_v47 = vpop.f32.mrb[6].mxu1 }
 0x44e   : > { %v1299_v48 = vpop.f32.mrb[7].mxu1 }
 0x453   : > { %v783_v49 = vpop.f32.mrb[8].mxu1 }
 0x454   : > { %v1310_v50 = vpop.f32.mrb[9].mxu1  ;;  %v789_v51 = vsel %vm521_vm3, %v783_v49, -inf }
 0x455   : > { %790 = vmax.xlane.f32.xlu1 %v789_v51  ;;  %v786_v52 = vpop.f32.mrb[10].mxu1  ;;  %v1482_v50 = vld [vmem:[#allocation13 + $0x8] sm:$0xff]  }
 0x456   : > { %v1311_v53 = vpop.f32.mrb[11].mxu1 }
 0x45b   : > { %v893_v54 = vpop.f32.mrb[12].mxu1 }
 0x45c   : > { %v1322_v55 = vpop.f32.mrb[13].mxu1  ;;  %v899_v56 = vsel %vm521_vm3, %v893_v54, -inf }
 0x45d   : > { %900 = vmax.xlane.f32.xlu0 %v899_v56  ;;  %v896_v57 = vpop.f32.mrb[14].mxu1 }
 0x45e   : > { %v1323_v58 = vpop.f32.mrb[15].mxu1 }
 0x4d2   : > { %v570_v59 = vpop.xlane.xlu1 %569 }
 0x4d3   : > { %v571_v60 = vsub.f32 %v562_v39, %v570_v59 }
 0x4d5   : > { %v572_v61 = vmul.f32 1.442695, %v571_v60 }
 0x4d7   : > { %1485 = vpow2.f32 %v572_v61 }
 0x4da   : > { %v681_v62 = vpop.xlane.xlu0 %680 }
 0x4db   : > { %v682_v63 = vsub.f32 %v673_v44, %v681_v62 }
 0x4dd   : > { %v683_v1 = vmul.f32 1.442695, %v682_v63 }
 0x4df   : > { %1487 = vpow2.f32 %v683_v1 }
 0x4e1   : > { %v1486_v2 = vpop.eup %1485 }
 0x4e2   : > { %v574_v3 = vsel %vm521_vm3, %v1486_v2, 0.0  ;;  %v791_v12 = vpop.xlane.xlu1 %790 }
 0x4e3   : > { %575 = vadd.xlane.f32.xlu1 %v574_v3  ;;  %v792_v13 = vsub.f32 %v783_v49, %v791_v12  ;;  %v1481_v49 = vld [vmem:[#allocation13] sm:$0xff]  }
 0x4e4   : > { %1331 = vmatpush3.bf16.msra.mxu1 %v1481_v49 }
 0x4e5   : > { %v793_v14 = vmul.f32 1.442695, %v792_v13  ;;  %1332 = vmatprep.subr.bf16.mxu1 %v1804_v8 }
 0x4e8   : > { %1333 = vmatpush3.bf16.msra.mxu1 %v1482_v50 }
 0x4e9   : > { %v1488_v4 = vpop.eup %1487 }
 0x4ea   : > { %v901_v5 = vpop.xlane.xlu0 %900  ;;  %v685_v6 = vsel %vm521_vm3, %v1488_v4, 0.0 }
 0x4eb   : > { %v902_v7 = vsub.f32 %v893_v54, %v901_v5  ;;  %686 = vadd.xlane.f32.xlu0 %v685_v6 }
 0x4ed   : > { %v903_v9 = vmul.f32 1.442695, %v902_v7 }
 0x4ef   : > { %1489 = vpow2.f32 %v903_v9 }
 0x4f0   : > { %1491 = vpow2.f32 %v793_v14 }
 0x4f4   : > { %580 = vrot.lane.b32.xlu1 %v2157_v26, %s1813_s23  ;;  %s1055_s23 = scalar_lea.sflag [#allocation6], %s2116_s1 }
 0x4f9   : > { %v1490_v10 = vpop.eup %1489 }
 0x4fa   : > { %v905_v11 = vsel %vm521_vm3, %v1490_v10, 0.0  ;;  %v1492_v15 = vpop.eup %1491 }
 0x4fb   : > { %906 = vadd.xlane.f32.xlu0 %v905_v11  ;;  %v795_v16 = vsel %vm521_vm3, %v1492_v15, 0.0 }
 0x511   : > { %691 = vrot.lane.b32.xlu0 %v2157_v26, %s1814_s21  ;;  %s1703_s21 = sshll.u32 %s1820_s16, 4  ;;  %s1704_s21 = int_to_ptr.vmem [resolvable:$false] %s1703_s21 }
 0x512   : > { %p1706_p10 = scmp.lt.s32.totalorder %s2229_s19, %s1704_s21 }
 0x518   : > { %796 = vadd.xlane.f32.xlu1 %v795_v16 }
 0x529   : > { %801 = vrot.lane.b32.xlu1 %v2157_v26, %s1815_s12  ;;  %s1705_s12 = scalar_lea.vmem %s1704_s21, 256 }
 0x52a   : > { %p1707_p13 = scmp.lt.s32.totalorder %s1705_s12, %s1699_s27 }
 0x52c   : > { %p1708_p2 = por %p1707_p13, %p1706_p10 }
 0x52d   : > { %911 = vrot.lane.b32.xlu1 %v2157_v26, %s1816_s15 }
 0x52e   : > { %p1709_p8 = pnand %p1708_p2, %p1702_p7 }
 0x570   : > { %v576_v17 = vpop.xlane.xlu1 %575 }
 0x571   : > { %1493 = vrcp.f32 %v576_v17 }
 0x574   : > { %v581_v18 = vpop.permute.xlu1 %580 }
 0x575   : > { %v587_v19 = vsel %vm585_vm4, %v581_v18, 0 }
 0x576   : > { %1289 = vmatpush3.bf16.msra.mxu0 %v587_v19 }
 0x577   : > { %1300 = vmatprep.subr.bf16.mxu0 %v1804_v8 }
 0x578   : > { %v687_v21 = vpop.xlane.xlu0 %686 }
 0x579   : > { %1495 = vrcp.f32 %v687_v21 }
 0x57b   : > { %v1494_v20 = vpop.eup %1493 }
 0x57c   : > { %v578_v22 = vmul.f32 %v1494_v20, %v1486_v2  ;;  %v1036_v2 = vld [vmem:[#allocation3] sm:$0xff] }
 0x57e   : > { %v579_v23 = vpack.c.bf16 %v578_v22, %v578_v22 }
 0x580   : > { %1291 = vmatmul.mubr.msk.bf16.vlgmr.msra.gmra.mrb[4].mxu0 %vm521_vm3, %v579_v23 }
 0x581   : > { %1302 = vmatprep.mubr.msk.bf16.mxu0 %vm1805_vm1, %v1804_v8 }
 0x583   : > { %v1496_v24 = vpop.eup %1495 }
 0x584   : > { %v689_v26 = vmul.f32 %v1496_v24, %v1488_v4 }
 0x586   : > { %v690_v29 = vpack.c.bf16 %v689_v26, %v689_v26 }
 0x588   : > { %v907_v25 = vpop.xlane.xlu0 %906 }
 0x58c   : > { %v692_v27 = vpop.permute.xlu0 %691 }
 0x58d   : > { %v697_v28 = vsel %vm585_vm4, %v692_v27, 0 }
 0x58e   : > { %1301 = vmatpush3.bf16.msra.mxu0 %v697_v28 }
 0x58f   : > { %1312 = vmatprep.subr.bf16.mxu0 %v1804_v8 }
 0x591   : > { %1303 = vmatmul.mubr.msk.bf16.vlgmr.msra.gmra.mrb[8].mxu0 %vm521_vm3, %v690_v29 }
 0x592   : > { %1314 = vmatprep.mubr.msk.bf16.mxu0 %vm1805_vm1, %v1804_v8 }
 0x5a5   : > { %v797_v30 = vpop.xlane.xlu1 %796 }
 0x5a6   : > { %1497 = vrcp.f32 %v797_v30 }
 0x5a7   : > { %1499 = vrcp.f32 %v907_v25 }
 0x5a9   : > { %v802_v31 = vpop.permute.xlu1 %801 }
 0x5aa   : > { %v807_v32 = vsel %vm585_vm4, %v802_v31, 0 }
 0x5ab   : > { %1313 = vmatpush3.bf16.msra.mxu0 %v807_v32 }
 0x5ac   : > { %1324 = vmatprep.subr.bf16.mxu0 %v1804_v8 }
 0x5ad   : > { %v912_v35 = vpop.permute.xlu1 %911 }
 0x5ae   : > { %v917_v38 = vsel %vm585_vm4, %v912_v35, 0 }
 0x5b0   : > { %v1498_v33 = vpop.eup %1497 }
 0x5b1   : > { %v799_v34 = vmul.f32 %v1498_v33, %v1492_v15  ;;  %v1500_v37 = vpop.eup %1499 }
 0x5b2   : > { %v909_v39 = vmul.f32 %v1500_v37, %v1490_v10  ;;  %v1247_v10 = vld [vmem:[#allocation15] ss:$0 sm:$0xff] }
 0x5b3   : > { %v800_v36 = vpack.c.bf16 %v799_v34, %v799_v34 }
 0x5b4   : > { %v910_v40 = vpack.c.bf16 %v909_v39, %v909_v39 }
 0x5b5   : > { %1315 = vmatmul.mubr.msk.bf16.vlgmr.msra.gmra.mrb[12].mxu0 %vm521_vm3, %v800_v36 }
 0x5b6   : > { %1325 = vmatpush3.bf16.msra.mxu0 %v917_v38  ;;  %1326 = vmatprep.mubr.msk.bf16.mxu0 %vm1805_vm1, %v1804_v8 }
 0x5bd   : > { %1327 = vmatmul.mubr.msk.bf16.vlgmr.msra.gmra.mrb[16].mxu0 %vm521_vm3, %v910_v40 }
 0x653   : > { %v623_v41 = vpop.f32.mrb[4].mxu0 }
 0x654   : > { %v1292_v42 = vpop.f32.mrb[5].mxu0 }
 0x655   : > { %v626_v43 = vpop.f32.mrb[6].mxu0 }
 0x656   : > { %v1293_v44 = vpop.f32.mrb[7].mxu0 }
 0x664   : > { %v733_v45 = vpop.f32.mrb[8].mxu0 }
 0x665   : > { %960 = vrot.lane.b32.xlu0 %v733_v45, %s1817_s10  ;;  %v1304_v46 = vpop.f32.mrb[9].mxu0 }
 0x666   : > { %v736_v47 = vpop.f32.mrb[10].mxu0 }
 0x667   : > { %v1305_v48 = vpop.f32.mrb[11].mxu0 }
 0x688   : > { %v843_v51 = vpop.f32.mrb[12].mxu0 }
 0x689   : > { %964 = vrot.lane.b32.xlu1 %v843_v51, %s1818_s11  ;;  %v1316_v52 = vpop.f32.mrb[13].mxu0 }
 0x68a   : > { %v846_v53 = vpop.f32.mrb[14].mxu0 }
 0x68b   : > { %v1317_v54 = vpop.f32.mrb[15].mxu0 }
 0x690   : > { %v953_v55 = vpop.f32.mrb[16].mxu0 }
 0x691   : > { %968 = vrot.lane.b32.xlu0 %v953_v55, %s1819_s8  ;;  %v1328_v56 = vpop.f32.mrb[17].mxu0 }
 0x692   : > { %v956_v57 = vpop.f32.mrb[18].mxu0 }
 0x693   : > { %v1329_v58 = vpop.f32.mrb[19].mxu0 }
 0x6d7   : > { %v961_v59 = vpop.permute.xlu0 %960 }
 0x6d8   : > { %v971_v8 = vsel %vm521_vm3, %v623_v41, %v961_v59 }
 0x6fb   : > { %v965_v60 = vpop.permute.xlu1 %964 }
 0x6fc   : > { %v973_v61 = vsel %vm972_vm5, %v971_v8, %v965_v60 }
 0x703   : > { %v969_v62 = vpop.permute.xlu0 %968 }
 0x704   : > { %v975_v63 = vsel %vm974_vm6, %v973_v61, %v969_v62 }
 0x705   : > { %v976_v1 = vpack.c.bf16 %v975_v63, %v975_v63 }
 0x707   : > { %1335 = vmatmul.mubr.msk.bf16.vlgmr.msra.gmra.mrb[16].mxu1 %vm416_vm0, %v976_v1 }
 0x7da   : > { %v1030_v3 = vpop.f32.mrb[16].mxu1 }
 0x7db   : > { %v1037_v4 = vadd.f32 %v1036_v2, %v1030_v3  ;;  %v1336_v5 = vpop.f32.mrb[17].mxu1 }
 0x7dc   : > { %v1033_v6 = vpop.f32.mrb[18].mxu1 }
 0x7dd   : > { %1038 = vst.msk [vmem:[#allocation3] sm:$0xff] %vm416_vm0, %v1037_v4  ;;  %v1337_v7 = vpop.f32.mrb[19].mxu1 }
 0x7e4   : > { %v1043_v9 = vld [vmem:[#allocation3] sm:$0xff] }
 0x7e5   : > { %v1044_v11 = vadd.f32 %v1043_v9, %v2138_v0 }
 0x7e7   : > { %v1052_v12 = vadd.f32 %v1247_v10, %v1044_v11 }
 0x7e9   : > { %1053 = vst.msk [vmem:[%s407_s18] sm:$0xff] %vm416_vm0, %v1052_v12 }
 0x7ea   : > { %1712 = shalt.err (!%p1709_p8)
}
 0x7eb   : > { %s1713_s1 = scalar_lea.hbm %s2227_s17, 128  ;;  %s1717_s11 = scalar_lea.hbm %s2284_s7, 256 }
 0x7ec   : > { %p1714_p9 = scmp.ne.s32.totalorder %s2227_s17, %s1713_s1  ;;  %p1718_p3 = scmp.lt.u32.totalorder %s2227_s17, %s2284_s7 }
 0x7ed   : > { %p1719_p1 = scmp.lt.u32.totalorder %s1717_s11, %s1713_s1  ;;  %p1721_p11 = scmp.lt.u32.totalorder %s1713_s1, %s2227_s17 }
 0x7ee   : > { %p1715_p4 = pnand %p1714_p9, %p2307_p0 }
 0x7ef   : > { %p1720_p12 = por %p1719_p1, %p1718_p3 }
 0x7f0   : > { %p1716_p6 = pneg %p1715_p4 }
 0x7f1   : > { %p1722_p5 = por %p1721_p11, %p1720_p12 }
 0x7f3   : > { %p1723_p7 = pnand %p1722_p5, %p1716_p6 }
 0x7f5   : > { %1726 = shalt.err (!%p1723_p7)
}
 0x7f6   : > { %1364 = dma.vmem_to_hbm [thread:$0]  (%p2307_p0), %s2229_s19, 128, %s2227_s17, %s1055_s23  }
 0x7f7 PF: > { %s1080_s18 = sand.u32 1, %s1773_s24   ;;  %p2308_p10 = scmp.ne.s32.totalorder %s2303_s30, 0 }
 0x7f8   : > { %p2309_p13 = scmp.ge.s32.totalorder %s1793_s29, 2  ;;  %s1081_s22 = scalar_lea.sflag [#allocation6], %s1080_s18 }
 0x7fa   : > { %p1390_p2 = pnand %p2309_p13, %p2308_p10 }
 0x7fc   : > { %1768 = dma.done.wait (!%p1390_p2), %s1081_s22, 128  }
 0x7fd   : > { %1770 = vsyncadd (!%p1390_p2), %s1081_s22, 4294967168  ;;  %s26_s29 = sadd.s32 1, %s1793_s29   ;;  %s2310_s24 = smov %s1777_s25 }
 0x7fe   : > { %p23_p8 = scmp.ge.s32.totalorder %s26_s29, 4   ;;  %s2311_s25 = smov %s1781_s26 }
 0x7ff   : > { %s2312_s26 = smov %s2066_s20  ;;  %s2313_s27 = smov %s1789_s28 }
 0x800   : > { %s2314_s28 = smov %s2316_s13  ;;  %25 = sbr.rel (!%p23_p8) target bundleno = 12 (0xc), region = 128 }
 0x807   :  { %1086 = vsyncpa [#allocation5], 1 }
 0x808   :  { %1088 = vsyncpa [#allocation5 + $0x1], 1 }
 0x809   :  { %1089 = vsyncpa [#allocation8], 1 }
 0x80a   :  { %1090 = vsyncpa [#allocation11], 1 }
 0x80b   :  { %1091 = vsyncpa [#allocation14], 1 }
 0x80c   :  { %1092 = vsyncpa [#allocation6], 1 }
 0x80d   :  { %1094 = vsyncpa [#allocation6 + $0x1], 1 }

</bundles_post_ra>
